<compile_context>
chip_gen: v5e
topology: v5e:2x2
jax: 0.10.0
libtpu: 0.0.40
codegen_flags: <defaults>
</compile_context>

<pallas_src>
import jax
import jax.numpy as jnp
from jax.experimental import pallas as pl
from jax.experimental.pallas import tpu as pltpu

D_K = 16
D_V = 16
D_MODEL = 128
N_HEADS = 8


def _mha_kernel(xq_ref, xk_ref, xv_ref, mask_ref,
                wq_ref, wk_ref, wv_ref, wfc_ref,
                seg_dn_ref, seg_nd_ref, gamma_ref, beta_ref,
                out_ref, attn_ref):
    Bt, L, D = xq_ref.shape              # (Bt, L, 128)
    H = attn_ref.shape[1]                # n_heads

    xq3 = xq_ref[...]                    # (Bt, L, D)   query rows / residual
    xq = xq3.reshape(Bt * L, D)          # (Bt*L, D)
    xk = xk_ref[:, 0, :]                 # (Bt, D)      single key vector per batch
    xv = xv_ref[:, 0, :]                 # (Bt, D)
    mask3 = mask_ref[...]                # (Bt, L, L)   int32, nonzero == masked

    # ---- projections (weights pre-transposed; W_Q pre-scaled by 1/sqrt(d_k)) --------
    qs = jnp.dot(xq, wq_ref[...], preferred_element_type=jnp.float32)   # (Bt*L, D)
    kp = jnp.dot(xk, wk_ref[...], preferred_element_type=jnp.float32)   # (Bt, D)
    vp = jnp.dot(xv, wv_ref[...], preferred_element_type=jnp.float32)   # (Bt, D)

    # ---- all-head scaled logits: c[b,q,h] = sum_{d in head h} qs[b,q,d]*kp[b,d] ------
    qk = qs.reshape(Bt, L, D) * kp[:, None, :]                          # (Bt, L, D)
    c = jnp.dot(qk.reshape(Bt * L, D), seg_dn_ref[...],                 # (Bt*L, H)
                preferred_element_type=jnp.float32)
    c_hq = jnp.transpose(c.reshape(Bt, L, H), (0, 2, 1))                # (Bt, H, L)

    # ---- masked softmax over key axis (attn tensor is a module output) ---------------
    neg_inf = jnp.float32(-1e9)
    logits = jnp.broadcast_to(c_hq[:, :, :, None], (Bt, H, L, L))
    masked = jnp.broadcast_to(mask3[:, None, :, :] != 0, (Bt, H, L, L))
    logits = jnp.where(masked, neg_inf, logits)
    m = jnp.max(logits, axis=-1, keepdims=True)
    e = jnp.exp(logits - m)
    s = jnp.sum(e, axis=-1, keepdims=True)
    attn4 = e / s                                                       # (Bt, H, L, L)
    attn_ref[...] = attn4

    # ---- context: all key/value rows are identical per batch, so attn @ V reduces to
    #      (row-sum of attn per head) * projected V row ------------------------------
    asum = jnp.sum(attn4, axis=-1)                                      # (Bt, H, L)
    asum2 = jnp.transpose(asum, (0, 2, 1)).reshape(Bt * L, H)           # (Bt*L, H)
    asum_exp = jnp.dot(asum2, seg_nd_ref[...],                          # (Bt*L, D)
                       preferred_element_type=jnp.float32)
    ctx = (asum_exp.reshape(Bt, L, D) * vp[:, None, :]).reshape(Bt * L, D)

    # ---- output projection + residual + LayerNorm(d_model) --------------------------
    out = jnp.dot(ctx, wfc_ref[...], preferred_element_type=jnp.float32) + xq
    mu = jnp.mean(out, axis=-1, keepdims=True)
    var = jnp.mean((out - mu) ** 2, axis=-1, keepdims=True)
    norm = (out - mu) * jax.lax.rsqrt(var + jnp.float32(1e-5))
    y = norm * gamma_ref[...] + beta_ref[...]
    out_ref[...] = y.reshape(Bt, L, D)


def _pick_block_batch(B, max_bt=16):
    """Largest divisor of B <= max_bt, preferring choices that keep >= 2 grid steps
    (so v7x's two TensorCores both get work via the 'parallel' grid axis)."""
    divisors = [d for d in range(1, B + 1) if B % d == 0 and d <= max_bt]
    multi = [d for d in divisors if B // d >= 2]
    return max(multi) if multi else max(divisors)


def inner_mha_pallas(input_Q, input_K, input_V, attn_mask,
                     W_Q, W_K, W_V, W_fc, gamma, beta, *, block_batch=None):
    """input_Q: (B, L, 128); input_K/V: (B, 128); attn_mask: (B, L, L) (nonzero == masked)."""
    B, L, D = input_Q.shape
    assert D == D_MODEL and N_HEADS * D_K == D_MODEL and D_K == D_V
    assert L % 8 == 0, "sequence length must be a multiple of 8 (sublane tiling)"

    Bt = block_batch if block_batch is not None else _pick_block_batch(B)
    assert B % Bt == 0

    xq = input_Q.astype(jnp.float32)
    xk = input_K.reshape(B, 1, D).astype(jnp.float32)     # NOT repeated over L
    xv = input_V.reshape(B, 1, D).astype(jnp.float32)
    mask = attn_mask.astype(jnp.int32)

    # Pre-transpose torch (out, in) weights -> (in, out); fold 1/sqrt(d_k) into W_Q.
    inv_sqrt_dk = 1.0 / float(D_K) ** 0.5
    wq_s = (W_Q.T * jnp.float32(inv_sqrt_dk)).astype(jnp.float32)
    wk_t = W_K.T.astype(jnp.float32)
    wv_t = W_V.T.astype(jnp.float32)
    wfc_t = W_fc.T.astype(jnp.float32)
    gamma2 = gamma.reshape(1, D_MODEL).astype(jnp.float32)
    beta2 = beta.reshape(1, D_MODEL).astype(jnp.float32)

    # Head-segment indicator matrices (constant-folded by XLA): seg_dn sums each head's
    # d_k lanes; seg_nd broadcasts a per-head scalar across its d_v lanes.
    lane_head = jnp.arange(D_MODEL) // D_K
    seg_dn = (lane_head[:, None] == jnp.arange(N_HEADS)[None, :]).astype(jnp.float32)  # (D, H)
    seg_nd = seg_dn.T                                                                   # (H, D)

    out, attn = pl.pallas_call(
        _mha_kernel,
        out_shape=(
            jax.ShapeDtypeStruct((B, L, D_MODEL), jnp.float32),
            jax.ShapeDtypeStruct((B, N_HEADS, L, L), jnp.float32),
        ),
        grid_spec=pltpu.PrefetchScalarGridSpec(
            num_scalar_prefetch=0,
            grid=(B // Bt,),
            in_specs=[
                pl.BlockSpec((Bt, L, D_MODEL), lambda b: (b, 0, 0)),   # xq
                pl.BlockSpec((Bt, 1, D_MODEL), lambda b: (b, 0, 0)),   # xk (unbroadcast)
                pl.BlockSpec((Bt, 1, D_MODEL), lambda b: (b, 0, 0)),   # xv (unbroadcast)
                pl.BlockSpec((Bt, L, L), lambda b: (b, 0, 0)),         # mask
                pl.BlockSpec((D_MODEL, D_MODEL), lambda b: (0, 0)),    # W_Q^T / sqrt(d_k)
                pl.BlockSpec((D_MODEL, D_MODEL), lambda b: (0, 0)),    # W_K^T
                pl.BlockSpec((D_MODEL, D_MODEL), lambda b: (0, 0)),    # W_V^T
                pl.BlockSpec((D_MODEL, D_MODEL), lambda b: (0, 0)),    # fc^T
                pl.BlockSpec((D_MODEL, N_HEADS), lambda b: (0, 0)),    # seg_dn
                pl.BlockSpec((N_HEADS, D_MODEL), lambda b: (0, 0)),    # seg_nd
                pl.BlockSpec((1, D_MODEL), lambda b: (0, 0)),          # gamma
                pl.BlockSpec((1, D_MODEL), lambda b: (0, 0)),          # beta
            ],
            out_specs=[
                pl.BlockSpec((Bt, L, D_MODEL), lambda b: (b, 0, 0)),
                pl.BlockSpec((Bt, N_HEADS, L, L), lambda b: (b, 0, 0, 0)),
            ],
        ),
        compiler_params=pltpu.CompilerParams(
            dimension_semantics=("parallel",)),
    )(xq, xk, xv, mask, wq_s, wk_t, wv_t, wfc_t, seg_dn, seg_nd, gamma2, beta2)
    return out, attn


def inner_mha_reference(input_Q, input_K, input_V, attn_mask,
                        W_Q, W_K, W_V, W_fc, gamma, beta):
    """Pure-JAX mirror of the PyTorch forward (for correctness check)."""
    B, L, D = input_Q.shape
    xk1 = jnp.broadcast_to(input_K[:, None, :], (B, L, D))
    xv1 = jnp.broadcast_to(input_V[:, None, :], (B, L, D))
    Q = (input_Q @ W_Q.T).reshape(B, L, N_HEADS, D_K).transpose(0, 2, 1, 3)
    K = (xk1 @ W_K.T).reshape(B, L, N_HEADS, D_K).transpose(0, 2, 1, 3)
    V = (xv1 @ W_V.T).reshape(B, L, N_HEADS, D_V).transpose(0, 2, 1, 3)
    scores = jnp.einsum("bhqd,bhkd->bhqk", Q, K) / jnp.sqrt(jnp.float32(D_K))
    scores = jnp.where(attn_mask[:, None, :, :] != 0, jnp.float32(-1e9), scores)
    attn = jax.nn.softmax(scores, axis=-1)
    ctx = jnp.einsum("bhqk,bhkd->bhqd", attn, V).transpose(0, 2, 1, 3).reshape(B, L, N_HEADS * D_V)
    out = ctx @ W_fc.T + input_Q
    mean = out.mean(-1, keepdims=True)
    var = ((out - mean) ** 2).mean(-1, keepdims=True)
    out = (out - mean) / jnp.sqrt(var + 1e-5) * gamma + beta
    return out, attn


if __name__ == "__main__":
    B, L = 2, 8

    key = jax.random.PRNGKey(0)
    k_xq, k_xk, k_xv, k_wq, k_wk, k_wv, k_fc = jax.random.split(key, 7)

    input_Q = jax.random.normal(k_xq, (B, L, D_MODEL), jnp.float32)
    input_K = jax.random.normal(k_xk, (B, D_MODEL), jnp.float32)
    input_V = jax.random.normal(k_xv, (B, D_MODEL), jnp.float32)

    # deterministic mask: last 2 key positions masked out for every query row
    attn_mask = jnp.zeros((B, L, L), jnp.int32).at[:, :, L - 2:].set(1)

    # deterministic parameter init (shapes follow nn.Linear(out, in), bias=False)
    bound = 1.0 / (D_MODEL ** 0.5)
    W_Q = jax.random.uniform(k_wq, (D_K * N_HEADS, D_MODEL), jnp.float32, -bound, bound)
    W_K = jax.random.uniform(k_wk, (D_K * N_HEADS, D_MODEL), jnp.float32, -bound, bound)
    W_V = jax.random.uniform(k_wv, (D_V * N_HEADS, D_MODEL), jnp.float32, -bound, bound)
    W_fc = jax.random.uniform(k_fc, (D_MODEL, N_HEADS * D_V), jnp.float32, -bound, bound)
    gamma = jnp.ones((D_MODEL,), jnp.float32)   # LayerNorm defaults
    beta = jnp.zeros((D_MODEL,), jnp.float32)

    out, attn = inner_mha_pallas(input_Q, input_K, input_V, attn_mask,
                                 W_Q, W_K, W_V, W_fc, gamma, beta)
    jax.block_until_ready((out, attn))

    out_exp, attn_exp = inner_mha_reference(input_Q, input_K, input_V, attn_mask,
                                            W_Q, W_K, W_V, W_fc, gamma, beta)

    assert out.shape == (B, L, D_MODEL) and attn.shape == (B, N_HEADS, L, L)
    assert jnp.allclose(out, out_exp, rtol=1e-4, atol=1e-4)
    assert jnp.allclose(attn, attn_exp, rtol=1e-4, atol=1e-4)

    print("KERNEL_OK")
</pallas_src>

<mosaic_0001>
module attributes {stable_mosaic.version = 11 : i64} {
  func.func @_mha_kernel(%arg0: i32, %arg1: memref<1x8x128xf32, #tpu.memory_space<vmem>>, %arg2: memref<1x1x128xf32, #tpu.memory_space<vmem>>, %arg3: memref<1x1x128xf32, #tpu.memory_space<vmem>>, %arg4: memref<1x8x8xi32, #tpu.memory_space<vmem>>, %arg5: memref<128x128xf32, #tpu.memory_space<vmem>>, %arg6: memref<128x128xf32, #tpu.memory_space<vmem>>, %arg7: memref<128x128xf32, #tpu.memory_space<vmem>>, %arg8: memref<128x128xf32, #tpu.memory_space<vmem>>, %arg9: memref<128x8xf32, #tpu.memory_space<vmem>>, %arg10: memref<8x128xf32, #tpu.memory_space<vmem>>, %arg11: memref<1x128xf32, #tpu.memory_space<vmem>>, %arg12: memref<1x128xf32, #tpu.memory_space<vmem>>, %arg13: memref<1x8x128xf32, #tpu.memory_space<vmem>>, %arg14: memref<1x8x8x8xf32, #tpu.memory_space<vmem>>) attributes {dimension_semantics = [#tpu.dimension_semantics<parallel>], iteration_bounds = array<i64: 2>, scalar_prefetch = 0 : i64, scratch_operands = 0 : i64, tpu.core_type = #tpu.core_type<tc>, window_params = [{transform_indices = @transform_0, window_bounds = array<i64: 1, 8, 128>}, {transform_indices = @transform_1, window_bounds = array<i64: 1, 1, 128>}, {transform_indices = @transform_2, window_bounds = array<i64: 1, 1, 128>}, {transform_indices = @transform_3, window_bounds = array<i64: 1, 8, 8>}, {pipeline_mode = #tpu.pipeline_mode<synchronous>, transform_indices = @transform_4, window_bounds = array<i64: 128, 128>}, {pipeline_mode = #tpu.pipeline_mode<synchronous>, transform_indices = @transform_5, window_bounds = array<i64: 128, 128>}, {pipeline_mode = #tpu.pipeline_mode<synchronous>, transform_indices = @transform_6, window_bounds = array<i64: 128, 128>}, {pipeline_mode = #tpu.pipeline_mode<synchronous>, transform_indices = @transform_7, window_bounds = array<i64: 128, 128>}, {pipeline_mode = #tpu.pipeline_mode<synchronous>, transform_indices = @transform_8, window_bounds = array<i64: 128, 8>}, {pipeline_mode = #tpu.pipeline_mode<synchronous>, transform_indices = @transform_9, window_bounds = array<i64: 8, 128>}, {pipeline_mode = #tpu.pipeline_mode<synchronous>, transform_indices = @transform_10, window_bounds = array<i64: 1, 128>}, {pipeline_mode = #tpu.pipeline_mode<synchronous>, transform_indices = @transform_11, window_bounds = array<i64: 1, 128>}, {transform_indices = @transform_12, window_bounds = array<i64: 1, 8, 128>}, {transform_indices = @transform_13, window_bounds = array<i64: 1, 8, 8, 8>}]} {
    %c0 = arith.constant 0 : index
    %c0_0 = arith.constant 0 : index
    %c0_1 = arith.constant 0 : index
    %0 = vector.load %arg1[%c0, %c0_0, %c0_1] : memref<1x8x128xf32, #tpu.memory_space<vmem>>, vector<1x8x128xf32>
    %1 = vector.shape_cast %0 : vector<1x8x128xf32> to vector<8x128xf32>
    %c0_2 = arith.constant 0 : index
    %c0_3 = arith.constant 0 : index
    %c0_4 = arith.constant 0 : index
    %2 = vector.load %arg2[%c0_2, %c0_3, %c0_4] : memref<1x1x128xf32, #tpu.memory_space<vmem>>, vector<1x1x128xf32>
    %3 = vector.shape_cast %2 : vector<1x1x128xf32> to vector<1x128xf32>
    %c0_5 = arith.constant 0 : index
    %c0_6 = arith.constant 0 : index
    %c0_7 = arith.constant 0 : index
    %4 = vector.load %arg3[%c0_5, %c0_6, %c0_7] : memref<1x1x128xf32, #tpu.memory_space<vmem>>, vector<1x1x128xf32>
    %5 = vector.shape_cast %4 : vector<1x1x128xf32> to vector<1x128xf32>
    %c0_8 = arith.constant 0 : index
    %c0_9 = arith.constant 0 : index
    %c0_10 = arith.constant 0 : index
    %6 = vector.load %arg4[%c0_8, %c0_9, %c0_10] : memref<1x8x8xi32, #tpu.memory_space<vmem>>, vector<1x8x8xi32>
    %c0_11 = arith.constant 0 : index
    %c0_12 = arith.constant 0 : index
    %7 = vector.load %arg5[%c0_11, %c0_12] : memref<128x128xf32, #tpu.memory_space<vmem>>, vector<128x128xf32>
    %cst = arith.constant dense<0.000000e+00> : vector<8x128xf32>
    %8 = tpu.matmul %1, %7, %cst {dimension_numbers = #tpu.dot_dimension_numbers<[1], [0], [0], [1], [0, 0, 1, 1], [], []>} : vector<8x128xf32>, vector<128x128xf32>, vector<8x128xf32> -> vector<8x128xf32>
    %c0_13 = arith.constant 0 : index
    %c0_14 = arith.constant 0 : index
    %9 = vector.load %arg6[%c0_13, %c0_14] : memref<128x128xf32, #tpu.memory_space<vmem>>, vector<128x128xf32>
    %cst_15 = arith.constant dense<0.000000e+00> : vector<1x128xf32>
    %10 = tpu.matmul %3, %9, %cst_15 {dimension_numbers = #tpu.dot_dimension_numbers<[1], [0], [0], [1], [0, 0, 1, 1], [], []>} : vector<1x128xf32>, vector<128x128xf32>, vector<1x128xf32> -> vector<1x128xf32>
    %c0_16 = arith.constant 0 : index
    %c0_17 = arith.constant 0 : index
    %11 = vector.load %arg7[%c0_16, %c0_17] : memref<128x128xf32, #tpu.memory_space<vmem>>, vector<128x128xf32>
    %cst_18 = arith.constant dense<0.000000e+00> : vector<1x128xf32>
    %12 = tpu.matmul %5, %11, %cst_18 {dimension_numbers = #tpu.dot_dimension_numbers<[1], [0], [0], [1], [0, 0, 1, 1], [], []>} : vector<1x128xf32>, vector<128x128xf32>, vector<1x128xf32> -> vector<1x128xf32>
    %13 = vector.shape_cast %8 : vector<8x128xf32> to vector<1x8x128xf32>
    %14 = vector.shape_cast %10 : vector<1x128xf32> to vector<1x1x128xf32>
    %15 = vector.broadcast %14 : vector<1x1x128xf32> to vector<1x8x128xf32>
    %16 = arith.mulf %13, %15 : vector<1x8x128xf32>
    %17 = vector.shape_cast %16 : vector<1x8x128xf32> to vector<8x128xf32>
    %c0_19 = arith.constant 0 : index
    %c0_20 = arith.constant 0 : index
    %18 = vector.load %arg9[%c0_19, %c0_20] : memref<128x8xf32, #tpu.memory_space<vmem>>, vector<128x8xf32>
    %cst_21 = arith.constant dense<0.000000e+00> : vector<8x8xf32>
    %19 = tpu.matmul %17, %18, %cst_21 {dimension_numbers = #tpu.dot_dimension_numbers<[1], [0], [0], [1], [0, 0, 1, 1], [], []>} : vector<8x128xf32>, vector<128x8xf32>, vector<8x8xf32> -> vector<8x8xf32>
    %20 = vector.shape_cast %19 : vector<8x8xf32> to vector<1x8x8xf32>
    %21 = tpu.transpose %20, [0, 2, 1] : vector<1x8x8xf32> -> vector<1x8x8xf32>
    %22 = vector.shape_cast %21 : vector<1x8x8xf32> to vector<1x8x8x1xf32>
    %23 = vector.shape_cast %22 : vector<1x8x8x1xf32> to vector<1x8x8x1xf32>
    %24 = vector.broadcast %23 : vector<1x8x8x1xf32> to vector<1x8x8x8xf32>
    %25 = vector.shape_cast %6 : vector<1x8x8xi32> to vector<1x1x8x8xi32>
    %c0_i32 = arith.constant 0 : i32
    %26 = vector.broadcast %c0_i32 : i32 to vector<1x1x8x8xi32>
    %27 = arith.cmpi ne, %25, %26 : vector<1x1x8x8xi32>
    %28 = vector.shape_cast %27 : vector<1x1x8x8xi1> to vector<1x1x8x8xi1>
    %29 = vector.broadcast %28 : vector<1x1x8x8xi1> to vector<1x8x8x8xi1>
    %cst_22 = arith.constant -1.000000e+09 : f32
    %30 = vector.broadcast %cst_22 : f32 to vector<1x8x8x8xf32>
    %31 = arith.select %29, %30, %24 : vector<1x8x8x8xi1>, vector<1x8x8x8xf32>
    %cst_23 = arith.constant dense<0xFF800000> : vector<1x8x8xf32>
    %32 = vector.multi_reduction <maximumf>, %31, %cst_23 [3] : vector<1x8x8x8xf32> to vector<1x8x8xf32>
    %33 = vector.shape_cast %32 : vector<1x8x8xf32> to vector<1x8x8x1xf32>
    %34 = vector.broadcast %33 : vector<1x8x8x1xf32> to vector<1x8x8x8xf32>
    %35 = arith.subf %31, %34 : vector<1x8x8x8xf32>
    %36 = math.exp %35 : vector<1x8x8x8xf32>
    %cst_24 = arith.constant dense<0.000000e+00> : vector<1x8x8xf32>
    %37 = vector.multi_reduction <add>, %36, %cst_24 [3] : vector<1x8x8x8xf32> to vector<1x8x8xf32>
    %38 = vector.shape_cast %37 : vector<1x8x8xf32> to vector<1x8x8x1xf32>
    %39 = vector.broadcast %38 : vector<1x8x8x1xf32> to vector<1x8x8x8xf32>
    %40 = arith.divf %36, %39 : vector<1x8x8x8xf32>
    %c0_25 = arith.constant 0 : index
    %c0_26 = arith.constant 0 : index
    %c0_27 = arith.constant 0 : index
    %c0_28 = arith.constant 0 : index
    %41 = vector.load %arg14[%c0_25, %c0_26, %c0_27, %c0_28] : memref<1x8x8x8xf32, #tpu.memory_space<vmem>>, vector<1x8x8x8xf32>
    tpu.vector_store %arg14[%c0_25, %c0_26, %c0_27, %c0_28], %40 {strides = array<i32>} : memref<1x8x8x8xf32, #tpu.memory_space<vmem>>, vector<1x8x8x8xf32>,
    %cst_29 = arith.constant dense<0.000000e+00> : vector<1x8x8xf32>
    %42 = vector.multi_reduction <add>, %40, %cst_29 [3] : vector<1x8x8x8xf32> to vector<1x8x8xf32>
    %43 = tpu.transpose %42, [0, 2, 1] : vector<1x8x8xf32> -> vector<1x8x8xf32>
    %44 = vector.shape_cast %43 : vector<1x8x8xf32> to vector<8x8xf32>
    %c0_30 = arith.constant 0 : index
    %c0_31 = arith.constant 0 : index
    %45 = vector.load %arg10[%c0_30, %c0_31] : memref<8x128xf32, #tpu.memory_space<vmem>>, vector<8x128xf32>
    %cst_32 = arith.constant dense<0.000000e+00> : vector<8x128xf32>
    %46 = tpu.matmul %44, %45, %cst_32 {dimension_numbers = #tpu.dot_dimension_numbers<[1], [0], [0], [1], [0, 0, 1, 1], [], []>} : vector<8x8xf32>, vector<8x128xf32>, vector<8x128xf32> -> vector<8x128xf32>
    %47 = vector.shape_cast %46 : vector<8x128xf32> to vector<1x8x128xf32>
    %48 = vector.shape_cast %12 : vector<1x128xf32> to vector<1x1x128xf32>
    %49 = vector.broadcast %48 : vector<1x1x128xf32> to vector<1x8x128xf32>
    %50 = arith.mulf %47, %49 : vector<1x8x128xf32>
    %51 = vector.shape_cast %50 : vector<1x8x128xf32> to vector<8x128xf32>
    %c0_33 = arith.constant 0 : index
    %c0_34 = arith.constant 0 : index
    %52 = vector.load %arg8[%c0_33, %c0_34] : memref<128x128xf32, #tpu.memory_space<vmem>>, vector<128x128xf32>
    %cst_35 = arith.constant dense<0.000000e+00> : vector<8x128xf32>
    %53 = tpu.matmul %51, %52, %cst_35 {dimension_numbers = #tpu.dot_dimension_numbers<[1], [0], [0], [1], [0, 0, 1, 1], [], []>} : vector<8x128xf32>, vector<128x128xf32>, vector<8x128xf32> -> vector<8x128xf32>
    %54 = arith.addf %53, %1 : vector<8x128xf32>
    %cst_36 = arith.constant dense<0.000000e+00> : vector<8xf32>
    %55 = vector.multi_reduction <add>, %54, %cst_36 [1] : vector<8x128xf32> to vector<8xf32>
    %56 = vector.shape_cast %55 : vector<8xf32> to vector<8x1xf32>
    %cst_37 = arith.constant 1.280000e+02 : f32
    %57 = vector.broadcast %cst_37 : f32 to vector<8x1xf32>
    %58 = arith.divf %56, %57 : vector<8x1xf32>
    %59 = vector.broadcast %58 : vector<8x1xf32> to vector<8x128xf32>
    %60 = arith.subf %54, %59 : vector<8x128xf32>
    %61 = arith.mulf %60, %60 : vector<8x128xf32>
    %cst_38 = arith.constant dense<0.000000e+00> : vector<8xf32>
    %62 = vector.multi_reduction <add>, %61, %cst_38 [1] : vector<8x128xf32> to vector<8xf32>
    %63 = vector.shape_cast %62 : vector<8xf32> to vector<8x1xf32>
    %cst_39 = arith.constant 1.280000e+02 : f32
    %64 = vector.broadcast %cst_39 : f32 to vector<8x1xf32>
    %65 = arith.divf %63, %64 : vector<8x1xf32>
    %66 = vector.broadcast %58 : vector<8x1xf32> to vector<8x128xf32>
    %67 = arith.subf %54, %66 : vector<8x128xf32>
    %cst_40 = arith.constant 9.99999974E-6 : f32
    %68 = vector.broadcast %cst_40 : f32 to vector<8x1xf32>
    %69 = arith.addf %65, %68 : vector<8x1xf32>
    %70 = math.rsqrt %69 : vector<8x1xf32>
    %71 = vector.broadcast %70 : vector<8x1xf32> to vector<8x128xf32>
    %72 = arith.mulf %67, %71 : vector<8x128xf32>
    %c0_41 = arith.constant 0 : index
    %c0_42 = arith.constant 0 : index
    %73 = vector.load %arg11[%c0_41, %c0_42] : memref<1x128xf32, #tpu.memory_space<vmem>>, vector<1x128xf32>
    %74 = vector.broadcast %73 : vector<1x128xf32> to vector<8x128xf32>
    %75 = arith.mulf %72, %74 : vector<8x128xf32>
    %c0_43 = arith.constant 0 : index
    %c0_44 = arith.constant 0 : index
    %76 = vector.load %arg12[%c0_43, %c0_44] : memref<1x128xf32, #tpu.memory_space<vmem>>, vector<1x128xf32>
    %77 = vector.broadcast %76 : vector<1x128xf32> to vector<8x128xf32>
    %78 = arith.addf %75, %77 : vector<8x128xf32>
    %79 = vector.shape_cast %78 : vector<8x128xf32> to vector<1x8x128xf32>
    %c0_45 = arith.constant 0 : index
    %c0_46 = arith.constant 0 : index
    %c0_47 = arith.constant 0 : index
    %80 = vector.load %arg13[%c0_45, %c0_46, %c0_47] : memref<1x8x128xf32, #tpu.memory_space<vmem>>, vector<1x8x128xf32>
    tpu.vector_store %arg13[%c0_45, %c0_46, %c0_47], %79 {strides = array<i32>} : memref<1x8x128xf32, #tpu.memory_space<vmem>>, vector<1x8x128xf32>,
    return
  }
  func.func @transform_0(%arg0: i32) -> (i32, i32, i32) {
    %c0_i32 = arith.constant 0 : i32
    %c0_i32_0 = arith.constant 0 : i32
    %c0_i32_1 = arith.constant 0 : i32
    return %arg0, %c0_i32, %c0_i32_0 : i32, i32, i32
  }
  func.func @transform_1(%arg0: i32) -> (i32, i32, i32) {
    %c0_i32 = arith.constant 0 : i32
    %c0_i32_0 = arith.constant 0 : i32
    %c0_i32_1 = arith.constant 0 : i32
    return %arg0, %c0_i32, %c0_i32_0 : i32, i32, i32
  }
  func.func @transform_2(%arg0: i32) -> (i32, i32, i32) {
    %c0_i32 = arith.constant 0 : i32
    %c0_i32_0 = arith.constant 0 : i32
    %c0_i32_1 = arith.constant 0 : i32
    return %arg0, %c0_i32, %c0_i32_0 : i32, i32, i32
  }
  func.func @transform_3(%arg0: i32) -> (i32, i32, i32) {
    %c0_i32 = arith.constant 0 : i32
    %c0_i32_0 = arith.constant 0 : i32
    %c0_i32_1 = arith.constant 0 : i32
    return %arg0, %c0_i32, %c0_i32_0 : i32, i32, i32
  }
  func.func @transform_4(%arg0: i32) -> (i32, i32) {
    %c0_i32 = arith.constant 0 : i32
    %c0_i32_0 = arith.constant 0 : i32
    %c0_i32_1 = arith.constant 0 : i32
    return %c0_i32, %c0_i32_0 : i32, i32
  }
  func.func @transform_5(%arg0: i32) -> (i32, i32) {
    %c0_i32 = arith.constant 0 : i32
    %c0_i32_0 = arith.constant 0 : i32
    %c0_i32_1 = arith.constant 0 : i32
    return %c0_i32, %c0_i32_0 : i32, i32
  }
  func.func @transform_6(%arg0: i32) -> (i32, i32) {
    %c0_i32 = arith.constant 0 : i32
    %c0_i32_0 = arith.constant 0 : i32
    %c0_i32_1 = arith.constant 0 : i32
    return %c0_i32, %c0_i32_0 : i32, i32
  }
  func.func @transform_7(%arg0: i32) -> (i32, i32) {
    %c0_i32 = arith.constant 0 : i32
    %c0_i32_0 = arith.constant 0 : i32
    %c0_i32_1 = arith.constant 0 : i32
    return %c0_i32, %c0_i32_0 : i32, i32
  }
  func.func @transform_8(%arg0: i32) -> (i32, i32) {
    %c0_i32 = arith.constant 0 : i32
    %c0_i32_0 = arith.constant 0 : i32
    %c0_i32_1 = arith.constant 0 : i32
    return %c0_i32, %c0_i32_0 : i32, i32
  }
  func.func @transform_9(%arg0: i32) -> (i32, i32) {
    %c0_i32 = arith.constant 0 : i32
    %c0_i32_0 = arith.constant 0 : i32
    %c0_i32_1 = arith.constant 0 : i32
    return %c0_i32, %c0_i32_0 : i32, i32
  }
  func.func @transform_10(%arg0: i32) -> (i32, i32) {
    %c0_i32 = arith.constant 0 : i32
    %c0_i32_0 = arith.constant 0 : i32
    %c0_i32_1 = arith.constant 0 : i32
    return %c0_i32, %c0_i32_0 : i32, i32
  }
  func.func @transform_11(%arg0: i32) -> (i32, i32) {
    %c0_i32 = arith.constant 0 : i32
    %c0_i32_0 = arith.constant 0 : i32
    %c0_i32_1 = arith.constant 0 : i32
    return %c0_i32, %c0_i32_0 : i32, i32
  }
  func.func @transform_12(%arg0: i32) -> (i32, i32, i32) {
    %c0_i32 = arith.constant 0 : i32
    %c0_i32_0 = arith.constant 0 : i32
    %c0_i32_1 = arith.constant 0 : i32
    return %arg0, %c0_i32, %c0_i32_0 : i32, i32, i32
  }
  func.func @transform_13(%arg0: i32) -> (i32, i32, i32, i32) {
    %c0_i32 = arith.constant 0 : i32
    %c0_i32_0 = arith.constant 0 : i32
    %c0_i32_1 = arith.constant 0 : i32
    %c0_i32_2 = arith.constant 0 : i32
    return %arg0, %c0_i32, %c0_i32_0, %c0_i32_1 : i32, i32, i32, i32
  }
}

</mosaic_0001>

<bundles_post_ra>
// kernel: tpu_custom_call.1
= control target key start
LH: loop header
LB: loop body
LE: loop exit
PB: predicated region body
PF: predicated region fallthrough
CT: control target
= control target key end

     0   :  { %s2474_s0 = inlined_call_operand.hbm [shape: f32[2,8,128], index: 0, kind: input, shape index: {}]   ;;  %s2475_s1 = inlined_call_operand.vmem [shape: f32[2,1,128], index: 1, kind: input, shape index: {}]   ;;  %s2476_s2 = inlined_call_operand.hbm [shape: f32[2,1,128], index: 2, kind: input, shape index: {}]   ;;  %s2477_s3 = inlined_call_operand.hbm [shape: s32[2,8,8], index: 3, kind: input, shape index: {}]   ;;  %s2478_s4 = inlined_call_operand.vmem [shape: f32[128,128], index: 4, kind: input, shape index: {}]   ;;  %s2479_s5 = inlined_call_operand.hbm [shape: f32[128,128], index: 5, kind: input, shape index: {}]   ;;  %s2480_s6 = inlined_call_operand.hbm [shape: f32[128,128], index: 6, kind: input, shape index: {}]   ;;  %s2481_s7 = inlined_call_operand.hbm [shape: f32[128,128], index: 7, kind: input, shape index: {}]   ;;  %s2482_s8 = inlined_call_operand.vmem [shape: f32[128,8], index: 8, kind: input, shape index: {}]   ;;  %s2483_s9 = inlined_call_operand.vmem [shape: f32[8,128], index: 9, kind: input, shape index: {}]   ;;  %s2484_s10 = inlined_call_operand.vmem [shape: f32[1,128], index: 10, kind: input, shape index: {}]   ;;  %s2485_s11 = inlined_call_operand.vmem [shape: f32[1,128], index: 11, kind: input, shape index: {}]   ;;  %s2486_s12 = inlined_call_operand.hbm [shape: f32[2,8,128], index: 12, kind: output, shape index: {0}]   ;;  %s2487_s13 = inlined_call_operand.hbm [shape: f32[2,8,8,8], index: 13, kind: output, shape index: {1}]  }
   0x1   :  { %2502 = sst [smem:[#allocation28_spill]] %s2476_s2 }
   0x2   :  { %2503 = sst [smem:[#allocation29_spill]] %s2479_s5 }
   0x3   :  { %2504 = sst [smem:[#allocation30_spill]] %s2480_s6 }
   0x4   :  { %2505 = sst [smem:[#allocation31_spill]] %s2481_s7 }
   0x5   :  { %2506 = sst [smem:[#allocation32_spill]] %s2483_s9 }
   0x6   :  { %2507 = sst [smem:[#allocation33_spill]] %s2484_s10 }
   0x7   :  { %2508 = sst [smem:[#allocation34_spill]] %s2485_s11 }
   0x8   :  { %2509 = sst [smem:[#allocation35_spill]] %s2486_s12 }
   0x9   :  { %2510 = sst [smem:[#allocation36_spill]] %s2487_s13 }
   0xa   :  { %19 = vsyncpa [#allocation3], 0 }
   0xb   :  { %21 = vsyncpa [#allocation3 + $0x1], 0 }
   0xc   :  { %22 = vsyncpa [#allocation6], 0 }
   0xd   :  { %24 = vsyncpa [#allocation6 + $0x1], 0 }
   0xe   :  { %25 = vsyncpa [#allocation9], 0 }
   0xf   :  { %26 = vsyncpa [#allocation12], 0 }
  0x10   :  { %27 = vsyncpa [#allocation4], 0 }
  0x11   :  { %29 = vsyncpa [#allocation4 + $0x1], 0 }
  0x12   :  { %30 = vsyncpa [#allocation15], 0 }
  0x13   :  { %32 = vsyncpa [#allocation15 + $0x1], 0  ;;  %s1997_s25 = smov 0   ;;  %s1999_s26 = smov 0  }
  0x14   :  { %s2001_s27 = smov 0   ;;  %s2003_s28 = smov 0  }
  0x15 LB: > { %2511 = sst [smem:[#allocation22_spill]] %s1905_s25  ;;  %s2021_s15 = sadd.s32 4294967295, %s1917_s28   ;;  %s1917_s28 = sphi %s2003_s28, %s2543_s28   ;;  %s1913_s27 = sphi %s2001_s27, %s2548_s27   ;;  %s1909_s26 = sphi %s1999_s26, %s2547_s26   ;;  %s1905_s25 = sphi %s1997_s25, %s2546_s25  }
  0x16   : > { %2512 = sst [smem:[#allocation23_spill]] %s1913_s27  ;;  %p1462_p0 = scmp.ge.s32.totalorder %s1917_s28, 1 }
  0x17   : > { %s2513_s5 = sld [smem:[#allocation29_spill]]  ;;  %p2501_p1 = scmp.eq.s32.totalorder %s2021_s15, 0 }
  0x18   : > { %p367_p2 = scmp.lt.s32.totalorder %s1917_s28, 3  ;;  %s1919_s17 = smov [#allocation8]  }
  0x19   : > { %s383_s18 = sshll.u32 %s1919_s17, 4  ;;  %s2488_s20 = smov 128   ;;  %s384_s18 = int_to_ptr.vmem [resolvable:$true] %s383_s18 }
  0x1a   : > { %p2026_p3 = pnand %p1462_p0, %p367_p2  ;;  %s2490_s21 = smov 8  }
  0x1b   : > { %s1461_s22 = sadd.s32 4294967294, %s1917_s28   ;;  %s2046_s23 = sadd.s32 1, %s1917_s28  }
  0x1c   : > { %p1510_p4 = pneg %p2026_p3  ;;  %2516 = sst [smem:[#allocation24_spill]] %s2046_s23 }
  0x1d   : > { %s381_s14 = sshll.u32 %s2513_s5, 4  ;;  %s45_s24 = sadd.s32 1, %s1913_s27  ;;  %s382_s14 = int_to_ptr.hbm [resolvable:$true] %s381_s14 }
  0x1e   : > { %p2035_p6 = pnand %p1510_p4, %p2501_p1  ;;  %s42_s29 = ssub.s32 %s1917_s28, %s2046_s23 }
  0x1f   : > { %p52_p7 = scmp.ne.s32.totalorder %s1913_s27, %s1909_s26  ;;  %p43_p8 = scmp.eq.s32.totalorder %s42_s29, 0 }
  0x20   : > { %1513 = dma.hbm_to_vmem [thread:$0]  (!%p2035_p6), %s382_s14, 2048, %s384_s18, [#allocation9], %s2488_s20, %s2488_s20, %s2490_s21  }
  0x21   : > { %p53_p9 = scmp.eq.s32.totalorder %s1917_s28, 0  ;;  %p58_p10 = scmp.ne.s32.totalorder %s1909_s26, %s1905_s25 }
  0x22   : > { %p328_p11 = scmp.eq.s32.totalorder %s2021_s15, 1  ;;  %p334_p2 = scmp.eq.s32.totalorder %s1461_s22, 1 }
  0x23   : > { %s2058_s30 = scalar_select %p43_p8, %s1913_s27, %s45_s24  }
  0x24   : > { %p54_p12 = por %p53_p9, %p52_p7  ;;  %p2062_p13 = por %p2501_p1, %p58_p10 }
  0x25   : > { %2517 = sst [smem:[#allocation25_spill]] %s2058_s30  ;;  %p2066_p0 = por %p328_p11, %p52_p7 }
  0x26   : > { %p1540_p4 = scmp.lt.s32.totalorder %s1917_s28, 2  ;;  %s2072_s18 = sand.u32 1, %s1913_s27  }
  0x27   : > { %s2519_s17 = scalar_select %p2066_p0, 1, 0 }
  0x28   : > { %p2074_p5 = por %p334_p2, %p58_p10  ;;  %s462_s24 = sand.u32 1, %s1917_s28  }
  0x29   : > { %2520 = sst [smem:[#allocation26_spill]] %s2519_s17  ;;  %p2079_p8 = pnand %p1540_p4, %p54_p12 }
  0x2a   : > { %s2521_s29 = scalar_select %p2074_p5, 1, 0 }
  0x2b   : > { %s2524_s2 = sld [smem:[#allocation28_spill]]  ;;  %s465_s27 = scalar_lea.vmem [#allocation5], %s2072_s18 }
  0x2c   : > { %2522 = sst [smem:[#allocation27_spill]] %s2521_s29  ;;  %s472_s23 = sshll.u32 %s465_s27, 4  ;;  %s473_s23 = int_to_ptr.vmem [resolvable:$true] %s472_s23 }
  0x2d   : > { %s2525_s6 = sld [smem:[#allocation30_spill]]  ;;  %s2091_s12 = scalar_lea.sflag [#allocation6], %s462_s24 }
  0x2e   : > { %p1661_p9 = pneg %p2079_p8 }
  0x31   : > { %s468_s30 = scalar_lea.hbm %s2524_s2, %s1917_s28  ;;  %s1664_s27 = scalar_lea.hbm %s2524_s2, 2 }
  0x32   : > { %s470_s22 = sshll.u32 %s468_s30, 4  ;;  %s471_s22 = int_to_ptr.hbm [resolvable:$true] %s470_s22 }
  0x33   : > { %s395_s29 = sshll.u32 %s2525_s6, 4  ;;  %s1657_s10 = sshra.s32 %s471_s22, 4  ;;  %s1658_s10 = int_to_ptr.hbm [resolvable:$true] %s1657_s10  ;;  %s396_s29 = int_to_ptr.hbm [resolvable:$true] %s395_s29 }
  0x34   : > { %s1659_s13 = scalar_lea.hbm %s1658_s10, 1  ;;  %p1665_p12 = scmp.lt.s32.totalorder %s1658_s10, %s2524_s2 }
  0x35   : > { %p1660_p7 = scmp.ne.s32.totalorder %s1658_s10, %s1659_s13  ;;  %p1666_p2 = scmp.lt.s32.totalorder %s1664_s27, %s1659_s13 }
  0x37   : > { %p1662_p10 = pnand %p1661_p9, %p1660_p7  ;;  %p1667_p4 = por %p1666_p2, %p1665_p12 }
  0x39   : > { %p1663_p11 = pneg %p1662_p10 }
  0x3b   : > { %p1668_p1 = pnand %p1667_p4, %p1663_p11 }
  0x3d   : > { %1671 = shalt.err (!%p1668_p1)
}
  0x3e   : > { %1526 = dma.hbm_to_vmem [thread:$0]  (!%p2079_p8), %s471_s22, 16, %s473_s23, %s2091_s12  }
  0x3f   : > { %s1922_s11 = smov [#allocation10]   ;;  %s2526_s7 = sld [smem:[#allocation31_spill]] }
  0x40   : > { %s397_s25 = sshll.u32 %s1922_s11, 4  ;;  %s2527_s10 = smov 8   ;;  %s398_s25 = int_to_ptr.vmem [resolvable:$true] %s397_s25 }
  0x41   : > { %s2528_s13 = smov 128   ;;  %s1923_s21 = smov [#allocation11]  }
  0x42   : > { %1516 = dma.hbm_to_vmem [thread:$0]  (!%p2035_p6), %s396_s29, 2048, %s398_s25, [#allocation9], %s2528_s13, %s2528_s13, %s2527_s10  }
  0x43   : > { %s411_s27 = sshll.u32 %s1923_s21, 4  ;;  %s1467_s30 = sshll.u32 %s2072_s18, 3  ;;  %s412_s27 = int_to_ptr.vmem [resolvable:$true] %s411_s27 }
  0x44   : > { %s1468_s23 = sshll.u32 %s1917_s28, 3  ;;  %s441_s22 = scalar_lea.vmem [#allocation2], %s1467_s30 }
  0x45   : > { %s409_s17 = sshll.u32 %s2526_s7, 4  ;;  %s449_s11 = sshll.u32 %s441_s22, 4  ;;  %s410_s17 = int_to_ptr.hbm [resolvable:$true] %s409_s17  ;;  %s450_s11 = int_to_ptr.vmem [resolvable:$true] %s449_s11 }
  0x46   : > { %1519 = dma.hbm_to_vmem [thread:$0]  (!%p2035_p6), %s410_s17, 2048, %s412_s27, [#allocation12], %s2528_s13, %s2528_s13, %s2527_s10  }
  0x47   : > { %s445_s2 = scalar_lea.hbm %s2474_s0, %s1468_s23  ;;  %s487_s21 = scalar_lea.hbm %s2477_s3, %s1468_s23 }
  0x48   : > { %s447_s6 = sshll.u32 %s445_s2, 4  ;;  %s438_s7 = scalar_lea.sflag [#allocation3], %s2072_s18  ;;  %s448_s6 = int_to_ptr.hbm [resolvable:$true] %s447_s6 }
  0x49   : > { %s1747_s19 = sshra.s32 %s448_s6, 4  ;;  %s1754_s13 = scalar_lea.hbm %s2474_s0, 16  ;;  %s1748_s19 = int_to_ptr.hbm [resolvable:$true] %s1747_s19 }
  0x4a   : > { %s1749_s9 = scalar_lea.hbm %s1748_s19, 8  ;;  %p1755_p10 = scmp.lt.s32.totalorder %s1748_s19, %s2474_s0 }
  0x4b   : > { %p1750_p1 = scmp.ne.s32.totalorder %s1748_s19, %s1749_s9  ;;  %p1756_p11 = scmp.lt.s32.totalorder %s1754_s13, %s1749_s9 }
  0x4d   : > { %p1752_p6 = pnand %p1750_p1, %p1661_p9  ;;  %p1757_p12 = por %p1756_p11, %p1755_p10 }
  0x4f   : > { %p1753_p7 = pneg %p1752_p6 }
  0x51   : > { %p1758_p2 = pnand %p1757_p12, %p1753_p7 }
  0x53   : > { %1761 = shalt.err (!%p1758_p2)
}
  0x54   : > { %1523 = dma.hbm_to_vmem [thread:$0]  (!%p2079_p8), %s448_s6, 128, %s450_s11, %s438_s7  }
  0x55   : > { %s489_s18 = sshll.u32 %s487_s21, 4  ;;  %s483_s23 = scalar_lea.vmem [#allocation7], %s1467_s30  ;;  %s490_s18 = int_to_ptr.hbm [resolvable:$true] %s489_s18 }
  0x56   : > { %s491_s22 = sshll.u32 %s483_s23, 4  ;;  %s1777_s24 = sshra.s32 %s490_s18, 4  ;;  %s492_s22 = int_to_ptr.vmem [resolvable:$true] %s491_s22  ;;  %s1778_s24 = int_to_ptr.hbm [resolvable:$true] %s1777_s24 }
  0x57   : > { %s1779_s5 = scalar_lea.hbm %s1778_s24, 8  ;;  %s1784_s25 = scalar_lea.hbm %s2477_s3, 16 }
  0x58   : > { %p1780_p4 = scmp.ne.s32.totalorder %s1778_s24, %s1779_s5  ;;  %p1785_p7 = scmp.lt.s32.totalorder %s1778_s24, %s2477_s3 }
  0x59   : > { %p1786_p10 = scmp.lt.s32.totalorder %s1784_s25, %s1779_s5 }
  0x5a   : > { %p1782_p1 = pnand %p1780_p4, %p1661_p9 }
  0x5b   : > { %p1787_p11 = por %p1786_p10, %p1785_p7 }
  0x5c   : > { %p1783_p6 = pneg %p1782_p1 }
  0x5e   : > { %p1788_p12 = pnand %p1787_p11, %p1783_p6 }
  0x60   : > { %1791 = shalt.err (!%p1788_p12)
}
  0x61   : > { %1529 = dma.hbm_to_vmem [thread:$0]  (!%p2079_p8), %s490_s18, 128, %s492_s22, %s2091_s12  }
  0x62   : > { %500 = sbr.rel (%p2026_p3) target bundleno = 1787 (0x6fb), region = 68  ;;  %s2155_s6 = sand.u32 (!%p2026_p3), 1, %s1909_s26  }
  0x63   : > { %s2158_s7 = sshll.u32 (!%p2026_p3), %s2155_s6, 3  ;;  %s503_s30 = scalar_lea.sflag (!%p2026_p3), [#allocation3], %s2155_s6 }
  0x64   : > { %s506_s11 = scalar_lea.vmem (!%p2026_p3), [#allocation2], %s2158_s7 }
  0x67   : > { %1880 = dma.done.wait (%p2062_p13), %s503_s30, 128  }
  0x68   : > { %1882 = vsyncadd (%p2062_p13), %s503_s30, 4294967168  ;;  %s512_s12 = sand.u32 1, %s2021_s15   ;;  %s515_s20 = scalar_lea.vmem [#allocation5], %s2155_s6 }
  0x69   : > { %s513_s16 = scalar_lea.sflag [#allocation6], %s512_s12 }
  0x6a   : > { %1884 = dma.done.wait (%p2062_p13), %s513_s16, 144  }
  0x6b   : > { %1886 = vsyncadd (%p2062_p13), %s513_s16, 4294967152  ;;  %s525_s21 = scalar_lea.vmem [#allocation7], %s2158_s7  ;;  %p2529_p3 = scmp.eq.s32.totalorder %s2021_s15, 0 }
  0x6d   : > { %1888 = dma.done.wait (%p2529_p3), [#allocation9], 4096   ;;  %p2530_p8 = pmov %p2529_p3 }
  0x6e   : > { %p2531_p9 = pmov %p2529_p3 }
  0x6f   : > { %1890 = vsyncadd (%p2530_p8), [#allocation9], 4294963200 }
  0x70   : > { %1892 = dma.done.wait (%p2531_p9), [#allocation12], 2048   ;;  %p2532_p2 = pmov %p2529_p3 }
  0x71   : > { %v659_v0 = vld [vmem:[#allocation8 + $0x78] sm:$0xff]  ;;  %v658_v2 = vld [vmem:[#allocation8 + $0x70] sm:$0xff]  ;;  %v657_v4 = vld [vmem:[#allocation8 + $0x68] sm:$0xff]  ;;  %p601_p13 = scmp.lt.s32.totalorder %s2021_s15, 1  ;;  %v787_v54 = vlaneseq  ;;  %vm853_vm1 = vcmask 64512   ;;  %s2533_s12 = sld [smem:[#allocation32_spill]] }
  0x72   : > { %1894 = vsyncadd (%p2532_p2), [#allocation12], 4294965248  ;;  %v623_v1 = vld [vmem:[%s2478_s4 + $0x78] sm:$0xff]  ;;  %660 = vmatpush.msra.mxu1 %v659_v0  ;;  %v622_v3 = vld [vmem:[%s2478_s4 + $0x70] sm:$0xff]  ;;  %s1487_s16 = sshll.u32 %s2021_s15, 6  ;;  %s2535_s14 = sld [smem:[#allocation36_spill]] }
  0x73   : > { %624 = vmatpush.msra.mxu0 %v623_v1  ;;  %v621_v5 = vld [vmem:[%s2478_s4 + $0x68] sm:$0xff]  ;;  %v620_v7 = vld [vmem:[%s2478_s4 + $0x60] sm:$0xff]  ;;  %v619_v9 = vld [vmem:[%s2478_s4 + $0x58] sm:$0xff]  ;;  %s602_s2 = scalar_select %p601_p13, %s2021_s15, 1  ;;  %v788_v55 = vshrl.u32 %v787_v54, 7 }
  0x74   : > { %661 = vmatpush.msra.mxu1 %v658_v2  ;;  %v656_v6 = vld [vmem:[#allocation8 + $0x60] sm:$0xff]  ;;  %v655_v8 = vld [vmem:[#allocation8 + $0x58] sm:$0xff]  ;;  %v654_v10 = vld [vmem:[#allocation8 + $0x50] sm:$0xff]  ;;  %s1249_s23 = scalar_lea.sflag [#allocation15], %s2155_s6 }
  0x75   : > { %625 = vmatpush.msra.mxu0 %v622_v3  ;;  %v618_v11 = vld [vmem:[%s2478_s4 + $0x50] sm:$0xff]  ;;  %v617_v13 = vld [vmem:[%s2478_s4 + $0x48] sm:$0xff]  ;;  %v733_v14 = vld [vmem:[%s2482_s8 + $0x78] sm:$0xff]  ;;  %s603_s30 = scalar_lea.vmem %s2475_s1, %s602_s2  ;;  %1588 = vset.pattern.permute.xlu2 %v788_v55 }
  0x76   : > { %662 = vmatpush.msra.mxu1 %v657_v4  ;;  %v653_v12 = vld [vmem:[#allocation8 + $0x48] sm:$0xff]  ;;  %v652_v16 = vld [vmem:[#allocation8 + $0x40] sm:$0xff]  ;;  %734 = vmatpush.msra.mxu3 %v733_v14  ;;  %v651_v19 = vld [vmem:[#allocation8 + $0x38] sm:$0xff] }
  0x77   : > { %626 = vmatpush.msra.mxu0 %v621_v5  ;;  %v732_v15 = vld [vmem:[%s2482_s8 + $0x70] sm:$0xff]  ;;  %v616_v17 = vld [vmem:[%s2478_s4 + $0x40] sm:$0xff]  ;;  %v731_v18 = vld [vmem:[%s2482_s8 + $0x68] sm:$0xff]  ;;  %1587 = vset.pattern.permute.xlu1 %v788_v55 }
  0x78   : > { %663 = vmatpush.msra.mxu1 %v656_v6  ;;  %v615_v20 = vld [vmem:[%s2478_s4 + $0x38] sm:$0xff]  ;;  %735 = vmatpush.msra.mxu3 %v732_v15  ;;  %v730_v21 = vld [vmem:[%s2482_s8 + $0x60] sm:$0xff]  ;;  %v614_v23 = vld [vmem:[%s2478_s4 + $0x30] sm:$0xff]  ;;  %s1274_s27 = scalar_lea.hbm %s2535_s14, %s1487_s16  ;;  %s1827_s9 = scalar_lea.hbm %s2535_s14, 128 }
  0x79   : > { %627 = vmatpush.msra.mxu0 %v620_v7  ;;  %v650_v22 = vld [vmem:[#allocation8 + $0x30] sm:$0xff]  ;;  %v649_v25 = vld [vmem:[#allocation8 + $0x28] sm:$0xff]  ;;  %v648_v28 = vld [vmem:[#allocation8 + $0x20] sm:$0xff]  ;;  %s1277_s18 = sshll.u32 %s1274_s27, 4  ;;  %s1278_s18 = int_to_ptr.hbm [resolvable:$true] %s1277_s18 }
  0x7a   : > { %664 = vmatpush.msra.mxu1 %v655_v8  ;;  %736 = vmatpush.msra.mxu3 %v731_v18  ;;  %v729_v24 = vld [vmem:[%s2482_s8 + $0x58] sm:$0xff]  ;;  %v613_v26 = vld [vmem:[%s2478_s4 + $0x28] sm:$0xff]  ;;  %v728_v27 = vld [vmem:[%s2482_s8 + $0x50] sm:$0xff]  ;;  %s1821_s22 = sshra.s32 %s1278_s18, 4  ;;  %s1822_s22 = int_to_ptr.hbm [resolvable:$true] %s1821_s22 }
  0x7b   : > { %628 = vmatpush.msra.mxu0 %v619_v9  ;;  %v612_v29 = vld [vmem:[%s2478_s4 + $0x20] sm:$0xff]  ;;  %v727_v30 = vld [vmem:[%s2482_s8 + $0x48] sm:$0xff]  ;;  %v611_v32 = vld [vmem:[%s2478_s4 + $0x18] sm:$0xff]  ;;  %p1828_p7 = scmp.lt.s32.totalorder %s1822_s22, %s2535_s14 }
  0x7c   : > { %665 = vmatpush.msra.mxu1 %v654_v10  ;;  %737 = vmatpush.msra.mxu3 %v730_v21  ;;  %v647_v31 = vld [vmem:[#allocation8 + $0x18] sm:$0xff]  ;;  %v646_v34 = vld [vmem:[#allocation8 + $0x10] sm:$0xff]  ;;  %v645_v37 = vld [vmem:[#allocation8 + $0x8] sm:$0xff] }
  0x7d   : > { %629 = vmatpush.msra.mxu0 %v618_v11  ;;  %v726_v33 = vld [vmem:[%s2482_s8 + $0x40] sm:$0xff]  ;;  %v610_v35 = vld [vmem:[%s2478_s4 + $0x10] sm:$0xff]  ;;  %v725_v36 = vld [vmem:[%s2482_s8 + $0x38] sm:$0xff] }
  0x7e   : > { %666 = vmatpush.msra.mxu1 %v653_v12  ;;  %738 = vmatpush.msra.mxu3 %v729_v24  ;;  %v609_v38 = vld [vmem:[%s2478_s4 + $0x8] sm:$0xff]  ;;  %v724_v39 = vld [vmem:[%s2482_s8 + $0x30] sm:$0xff]  ;;  %v608_v41 = vld [vmem:[%s2478_s4] sm:$0xff] }
  0x7f   : > { %630 = vmatpush.msra.mxu0 %v617_v13  ;;  %v644_v40 = vld [vmem:[#allocation8] sm:$0xff]  ;;  %v605_v42 = vld [vmem:[%s603_s30] sm:$0x1]  ;;  %v721_v46 = vld [vmem:[%s2482_s8 + $0x18] sm:$0xff] }
  0x80   : > { %667 = vmatpush.msra.mxu1 %v652_v16  ;;  %739 = vmatpush.msra.mxu3 %v728_v27  ;;  %v2266_v43 = vld [vmem:[%s506_s11] sm:$0xff]  ;;  %v720_v47 = vld [vmem:[%s2482_s8 + $0x10] sm:$0xff]  ;;  %s1823_s11 = scalar_lea.hbm %s1822_s22, 64 }
  0x81   : > { %631 = vmatpush.msra.mxu0 %v616_v17  ;;  %v723_v44 = vld [vmem:[%s2482_s8 + $0x28] sm:$0xff]  ;;  %v722_v45 = vld [vmem:[%s2482_s8 + $0x20] sm:$0xff]  ;;  %p1824_p4 = scmp.ne.s32.totalorder %s1822_s22, %s1823_s11  ;;  %p1829_p10 = scmp.lt.s32.totalorder %s1827_s9, %s1823_s11 }
  0x82   : > { %668 = vmatpush.msra.mxu1 %v651_v19  ;;  %740 = vmatpush.msra.mxu3 %v727_v30  ;;  %v719_v48 = vld [vmem:[%s2482_s8 + $0x8] sm:$0xff]  ;;  %v718_v49 = vld [vmem:[%s2482_s8] sm:$0xff] }
  0x83   : > { %632 = vmatpush.msra.mxu0 %v615_v20  ;;  %v607_v3 = vld [vmem:[%s525_s21] sm:$0xff]  ;;  %s1478_s21 = sshll.u32 %s2155_s6, 6  ;;  %p1825_p1 = pnand %p1824_p4, %p2066_p0 }
  0x84   : > { %669 = vmatpush.msra.mxu1 %v650_v22  ;;  %741 = vmatpush.msra.mxu3 %v726_v33  ;;  %vm842_vm0 = vcmp.ne.s32.totalorder %v607_v3, 0  ;;  %s2347_s19 = scalar_lea.vmem [#allocation14], %s1478_s21  ;;  %p1830_p11 = por %p1829_p10, %p1828_p7 }
  0x85   : > { %633 = vmatpush.msra.mxu0 %v614_v23  ;;  %s1275_s2 = sshll.u32 %s2347_s19, 4  ;;  %p1826_p6 = pneg %p1825_p1  ;;  %s1276_s2 = int_to_ptr.vmem [resolvable:$true] %s1275_s2 }
  0x86   : > { %670 = vmatpush.msra.mxu1 %v649_v25  ;;  %742 = vmatpush.msra.mxu3 %v725_v36 }
  0x87   : > { %634 = vmatpush.msra.mxu0 %v613_v26  ;;  %p1831_p12 = pnand %p1830_p11, %p1826_p6 }
  0x88   : > { %671 = vmatpush.msra.mxu1 %v648_v28  ;;  %743 = vmatpush.msra.mxu3 %v724_v39 }
  0x89   : > { %635 = vmatpush.msra.mxu0 %v612_v29 }
  0x8a   : > { %672 = vmatpush.msra.mxu1 %v647_v31  ;;  %744 = vmatpush.msra.mxu3 %v723_v44 }
  0x8b   : > { %636 = vmatpush.msra.mxu0 %v611_v32 }
  0x8c   : > { %673 = vmatpush.msra.mxu1 %v646_v34  ;;  %745 = vmatpush.msra.mxu3 %v722_v45 }
  0x8d   : > { %637 = vmatpush.msra.mxu0 %v610_v35 }
  0x8e   : > { %674 = vmatpush.msra.mxu1 %v645_v37  ;;  %746 = vmatpush.msra.mxu3 %v721_v46 }
  0x8f   : > { %638 = vmatpush.msra.mxu0 %v609_v38 }
  0x90   : > { %675 = vmatpush.msra.mxu1 %v644_v40  ;;  %747 = vmatpush.msra.mxu3 %v720_v47 }
  0x91   : > { %639 = vmatpush.msra.mxu0 %v608_v41  ;;  %676 = vmatmul.f32.vlgmr.msra.gmra.mxu1 %v605_v42 }
  0x92   : > { %640 = vmatmul.f32.vlgmr.msra.gmra.mxu0 %v2266_v43  ;;  %748 = vmatpush.msra.mxu3 %v719_v48 }
  0x94   : > { %749 = vmatpush.msra.mxu3 %v718_v49 }
 0x10e   : > { %v677_v50 = vpop.f32.mrf.mxu1 }
 0x10f   : > { %v641_v51 = vpop.f32.mrf.mxu0  ;;  %v716_v52 = vperm.slane %v677_v50, 0 }
 0x111   : > { %v717_v53 = vmul.f32 %v716_v52, %v641_v51 }
 0x113   : > { %750 = vmatmul.f32.vlgmr.msra.gmra.mxu3 %v717_v53 }
 0x196   : > { %v751_v56 = vpop.f32.mrf.mxu3 }
 0x197   : > { %754 = vxpose.xlu0.b32.start.end [1/1] (short) (narrow) %v751_v56, 8 }
 0x1fe   : > { %1586 = vset.pattern.permute.xlu0 %v788_v55 }
 0x23b   : > { %v770_v57 = vpop.trf.xlu0 }
 0x23c   : > { %v807_v58 = vperm.slane %v770_v57, 3  ;;  %v793_v59 = vperm.slane %v770_v57, 1  ;;  %v786_v60 = vperm.slane %v770_v57, 0  ;;  %v814_v61 = vperm.slane %v770_v57, 4 }
 0x23d   : > { %v800_v62 = vperm.slane %v770_v57, 2  ;;  %v828_v63 = vperm.slane %v770_v57, 6  ;;  %v821_v0 = vperm.slane %v770_v57, 5  ;;  %v835_v1 = vperm.slane %v770_v57, 7 }
 0x23e   : > { %812 = vperm.xlu2 %1588, %v807_v58   ;;  %798 = vperm.xlu1 %1587, %v793_v59  }
 0x23f   : > { %791 = vperm.xlu0 %1586, %v786_v60  }
 0x246   : > { %819 = vperm.xlu2 %1588, %v814_v61   ;;  %805 = vperm.xlu1 %1587, %v800_v62  }
 0x24e   : > { %833 = vperm.xlu2 %1588, %v828_v63   ;;  %826 = vperm.xlu1 %1587, %v821_v0  }
 0x256   : > { %840 = vperm.xlu1 %1587, %v835_v1  }
 0x298   : > { %v813_v2 = vpop.permute.xlu2 %812 }
 0x299   : > { %v848_v18 = vsel %vm842_vm0, -1e+09, %v813_v2 }
 0x29a   : > { %v863_v21 = vsel %vm853_vm1, %v848_v18, -inf }
 0x2a0   : > { %v820_v7 = vpop.permute.xlu2 %819 }
 0x2a1   : > { %v849_v11 = vsel %vm842_vm0, -1e+09, %v820_v7 }
 0x2a2   : > { %v866_v14 = vsel %vm853_vm1, %v849_v11, -inf }
 0x2a8   : > { %v834_v16 = vpop.permute.xlu2 %833 }
 0x2a9   : > { %v851_v17 = vsel %vm842_vm0, -1e+09, %v834_v16 }
 0x2aa   : > { %v872_v19 = vsel %vm853_vm1, %v851_v17, -inf }
 0x2b0   : > { %v799_v4 = vpop.permute.xlu1 %798 }
 0x2b1   : > { %v846_v5 = vsel %vm842_vm0, -1e+09, %v799_v4  ;;  %v792_v6 = vpop.permute.xlu0 %791 }
 0x2b2   : > { %v845_v8 = vsel %vm842_vm0, -1e+09, %v792_v6  ;;  %v857_v9 = vsel %vm853_vm1, %v846_v5, -inf }
 0x2b3   : > { %858 = vmax.xlane.f32.xlu1 %v857_v9  ;;  %v854_v10 = vsel %vm853_vm1, %v845_v8, -inf }
 0x2b4   : > { %855 = vmax.xlane.f32.xlu2 %v854_v10 }
 0x2b8   : > { %v806_v12 = vpop.permute.xlu1 %805 }
 0x2b9   : > { %v847_v13 = vsel %vm842_vm0, -1e+09, %v806_v12 }
 0x2ba   : > { %v860_v15 = vsel %vm853_vm1, %v847_v13, -inf }
 0x2bb   : > { %867 = vmax.xlane.f32.xlu1 %v866_v14 }
 0x2bc   : > { %861 = vmax.xlane.f32.xlu2 %v860_v15 }
 0x2c0   : > { %v827_v20 = vpop.permute.xlu1 %826 }
 0x2c1   : > { %v850_v22 = vsel %vm842_vm0, -1e+09, %v827_v20 }
 0x2c2   : > { %v869_v23 = vsel %vm853_vm1, %v850_v22, -inf }
 0x2c3   : > { %873 = vmax.xlane.f32.xlu1 %v872_v19 }
 0x2c4   : > { %864 = vmax.xlane.f32.xlu2 %v863_v21 }
 0x2c8   : > { %v841_v24 = vpop.permute.xlu1 %840 }
 0x2c9   : > { %v852_v25 = vsel %vm842_vm0, -1e+09, %v841_v24 }
 0x2ca   : > { %v875_v26 = vsel %vm853_vm1, %v852_v25, -inf }
 0x2cc   : > { %870 = vmax.xlane.f32.xlu2 %v869_v23 }
 0x2d4   : > { %876 = vmax.xlane.f32.xlu2 %v875_v26 }
 0x326   : > { %v859_v27 = vpop.xlane.xlu1 %858 }
 0x327   : > { %v879_v28 = vsub.f32 %v846_v5, %v859_v27  ;;  %v856_v29 = vpop.xlane.xlu2 %855 }
 0x328   : > { %v878_v30 = vsub.f32 %v845_v8, %v856_v29 }
 0x329   : > { %v888_v31 = vmul.f32 1.442695, %v879_v28 }
 0x32a   : > { %v886_v32 = vmul.f32 1.442695, %v878_v30 }
 0x32b   : > { %1591 = vpow2.f32 %v888_v31 }
 0x32c   : > { %1593 = vpow2.f32 %v886_v32 }
 0x32e   : > { %v868_v33 = vpop.xlane.xlu1 %867 }
 0x32f   : > { %v862_v34 = vpop.xlane.xlu2 %861  ;;  %v882_v38 = vsub.f32 %v849_v11, %v868_v33 }
 0x330   : > { %v880_v35 = vsub.f32 %v847_v13, %v862_v34 }
 0x331   : > { %v2306_v36 = vpop.eup %1591  ;;  %v894_v42 = vmul.f32 1.442695, %v882_v38 }
 0x332   : > { %v2308_v37 = vpop.eup %1593  ;;  %v890_v39 = vmul.f32 1.442695, %v880_v35  ;;  %v905_v40 = vsel %vm853_vm1, %v2306_v36, 0.0 }
 0x333   : > { %906 = vadd.xlane.f32.xlu2 %v905_v40  ;;  %v902_v41 = vsel %vm853_vm1, %v2308_v37, 0.0 }
 0x334   : > { %1595 = vpow2.f32 %v890_v39  ;;  %903 = vadd.xlane.f32.xlu1 %v902_v41 }
 0x335   : > { %1597 = vpow2.f32 %v894_v42 }
 0x336   : > { %v874_v44 = vpop.xlane.xlu1 %873 }
 0x337   : > { %v865_v45 = vpop.xlane.xlu2 %864  ;;  %v884_v48 = vsub.f32 %v851_v17, %v874_v44 }
 0x338   : > { %v881_v46 = vsub.f32 %v848_v18, %v865_v45 }
 0x339   : > { %v898_v51 = vmul.f32 1.442695, %v884_v48 }
 0x33a   : > { %v2314_v47 = vpop.eup %1595  ;;  %v892_v49 = vmul.f32 1.442695, %v881_v46 }
 0x33b   : > { %v908_v50 = vsel %vm853_vm1, %v2314_v47, 0.0  ;;  %v2318_v53 = vpop.eup %1597 }
 0x33c   : > { %1599 = vpow2.f32 %v892_v49  ;;  %909 = vadd.xlane.f32.xlu1 %v908_v50  ;;  %v914_v58 = vsel %vm853_vm1, %v2318_v53, 0.0 }
 0x33d   : > { %1601 = vpow2.f32 %v898_v51 }
 0x33f   : > { %v871_v52 = vpop.xlane.xlu2 %870 }
 0x340   : > { %v883_v55 = vsub.f32 %v850_v22, %v871_v52 }
 0x342   : > { %v2320_v56 = vpop.eup %1599  ;;  %v896_v57 = vmul.f32 1.442695, %v883_v55 }
 0x343   : > { %v911_v59 = vsel %vm853_vm1, %v2320_v56, 0.0  ;;  %v2326_v61 = vpop.eup %1601 }
 0x344   : > { %1603 = vpow2.f32 %v896_v57  ;;  %915 = vadd.xlane.f32.xlu1 %v914_v58  ;;  %912 = vadd.xlane.f32.xlu2 %v911_v59  ;;  %v920_v1 = vsel %vm853_vm1, %v2326_v61, 0.0 }
 0x347   : > { %v877_v60 = vpop.xlane.xlu2 %876 }
 0x348   : > { %v885_v62 = vsub.f32 %v852_v25, %v877_v60 }
 0x34a   : > { %v2328_v63 = vpop.eup %1603  ;;  %v900_v0 = vmul.f32 1.442695, %v885_v62 }
 0x34b   : > { %v917_v2 = vsel %vm853_vm1, %v2328_v63, 0.0 }
 0x34c   : > { %1605 = vpow2.f32 %v900_v0  ;;  %921 = vadd.xlane.f32.xlu1 %v920_v1  ;;  %918 = vadd.xlane.f32.xlu2 %v917_v2 }
 0x352   : > { %v2334_v3 = vpop.eup %1605 }
 0x353   : > { %v923_v4 = vsel %vm853_vm1, %v2334_v3, 0.0 }
 0x354   : > { %924 = vadd.xlane.f32.xlu0 %v923_v4 }
 0x3a6   : > { %v907_v5 = vpop.xlane.xlu2 %906 }
 0x3a7   : > { %v904_v6 = vpop.xlane.xlu1 %903  ;;  %1607 = vrcp.f32 %v907_v5  ;;  %v952_v14 = vand.u32 2147483648, %v907_v5  ;;  %v950_v17 = vand.u32 2147483647, %v907_v5  ;;  %vm946_vm4 = vweird.f32 %v907_v5 }
 0x3a8   : > { %1609 = vrcp.f32 %v904_v6  ;;  %v937_v16 = vand.u32 2147483648, %v904_v6  ;;  %v935_v19 = vand.u32 2147483647, %v904_v6  ;;  %vm931_vm5 = vweird.f32 %v904_v6 }
 0x3a9   : > { %v953_v22 = vor.u32 1.1754944e-38, %v952_v14  ;;  %vm951_vm8 = vcmp.eq.f32.partialorder %v950_v17, 8.507059e+37 }
 0x3aa   : > { %v938_v24 = vor.u32 1.1754944e-38, %v937_v16  ;;  %vm936_vm9 = vcmp.eq.f32.partialorder %v935_v19, 8.507059e+37 }
 0x3ad   : > { %v1608_v7 = vpop.eup %1607 }
 0x3ae   : > { %v1610_v8 = vpop.eup %1609  ;;  %v942_v9 = vmul.f32 %v1608_v7, %v907_v5  ;;  %vm947_vm2 = vweird.f32 %v1608_v7 }
 0x3af   : > { %v927_v10 = vmul.f32 %v1610_v8, %v904_v6  ;;  %v910_v11 = vpop.xlane.xlu1 %909  ;;  %vm932_vm3 = vweird.f32 %v1610_v8  ;;  %vm948_vm6 = vmor %vm946_vm4, %vm947_vm2 }
 0x3b0   : > { %v943_v12 = vsub.f32 1.0, %v942_v9  ;;  %1611 = vrcp.f32 %v910_v11  ;;  %vm933_vm7 = vmor %vm931_vm5, %vm932_vm3  ;;  %v967_v35 = vand.u32 2147483648, %v910_v11  ;;  %vm961_vm11 = vweird.f32 %v910_v11 }
 0x3b1   : > { %v928_v13 = vsub.f32 1.0, %v927_v10 }
 0x3b2   : > { %v944_v15 = vmul.f32 %v1608_v7, %v943_v12  ;;  %v968_v49 = vor.u32 1.1754944e-38, %v967_v35 }
 0x3b3   : > { %v929_v18 = vmul.f32 %v1610_v8, %v928_v13 }
 0x3b4   : > { %v945_v20 = vadd.f32 %v1608_v7, %v944_v15 }
 0x3b5   : > { %v930_v21 = vadd.f32 %v1610_v8, %v929_v18 }
 0x3b6   : > { %v1612_v23 = vpop.eup %1611  ;;  %v949_v25 = vsel %vm948_vm6, %v1608_v7, %v945_v20 }
 0x3b7   : > { %v957_v26 = vmul.f32 %v1612_v23, %v910_v11  ;;  %v2339_v27 = vpop.xlane.xlu1 %915  ;;  %v2341_v28 = vpop.xlane.xlu2 %912  ;;  %v934_v29 = vsel %vm933_vm7, %v1610_v8, %v930_v21  ;;  %v954_v30 = vsel %vm951_vm8, %v953_v22, %v949_v25  ;;  %vm962_vm10 = vweird.f32 %v1612_v23 }
 0x3b8   : > { %1613 = vrcp.f32 %v2339_v27  ;;  %v939_v31 = vsel %vm936_vm9, %v938_v24, %v934_v29  ;;  %v955_v34 = vmul.f32 %v2306_v36, %v954_v30  ;;  %vm963_vm12 = vmor %vm961_vm11, %vm962_vm10  ;;  %v997_v58 = vand.u32 2147483648, %v2339_v27 }
 0x3b9   : > { %v958_v32 = vsub.f32 1.0, %v957_v26  ;;  %1615 = vrcp.f32 %v2341_v28  ;;  %v940_v33 = vmul.f32 %v2308_v37, %v939_v31  ;;  %v965_v37 = vand.u32 2147483647, %v910_v11 }
 0x3ba   : > { %v1057_v40 = vsel %vm853_vm1, %v955_v34, 0.0  ;;  %1047 = vst.msk [vmem:[%s2347_s19 + $0x8] sm:$0xff] %vm853_vm1, %v955_v34  ;;  %v995_v60 = vand.u32 2147483647, %v2339_v27  ;;  %v980_v62 = vand.u32 2147483647, %v2341_v28  ;;  %vm991_vm15 = vweird.f32 %v2339_v27 }
 0x3bb   : > { %v959_v38 = vmul.f32 %v1612_v23, %v958_v32  ;;  %1046 = vst.msk [vmem:[%s2347_s19] sm:$0xff] %vm853_vm1, %v940_v33  ;;  %v1054_v39 = vsel %vm853_vm1, %v940_v33, 0.0  ;;  %1058 = vadd.xlane.f32.xlu1 %v1057_v40  ;;  %vm966_vm13 = vcmp.eq.f32.partialorder %v965_v37, 8.507059e+37  ;;  %v982_v2 = vand.u32 2147483648, %v2341_v28 }
 0x3bc   : > { %1055 = vadd.xlane.f32.xlu2 %v1054_v39  ;;  %vm976_vm2 = vweird.f32 %v2341_v28  ;;  %v998_v5 = vor.u32 1.1754944e-38, %v997_v58  ;;  %vm996_vm4 = vcmp.eq.f32.partialorder %v995_v60, 8.507059e+37  ;;  %vm981_vm5 = vcmp.eq.f32.partialorder %v980_v62, 8.507059e+37  ;;  %v1143_v60 = vld [vmem:[%s2533_s12] sm:$0xff]  ;;  %v690_v62 = vld [vmem:[#allocation10 + $0x50] sm:$0xff] }
 0x3bd   : > { %v960_v36 = vadd.f32 %v1612_v23, %v959_v38  ;;  %v983_v13 = vor.u32 1.1754944e-38, %v982_v2  ;;  %1162 = vmatpush.msrb.mxu0 %v1143_v60  ;;  %v688_v2 = vld [vmem:[#allocation10 + $0x40] sm:$0xff] }
 0x3be   : > { %v1614_v41 = vpop.eup %1613 }
 0x3bf   : > { %v1616_v42 = vpop.eup %1615  ;;  %v987_v44 = vmul.f32 %v1614_v41, %v2339_v27  ;;  %v2356_v45 = vpop.xlane.xlu1 %921  ;;  %v964_v48 = vsel %vm963_vm12, %v1612_v23, %v960_v36  ;;  %vm992_vm14 = vweird.f32 %v1614_v41 }
 0x3c0   : > { %v2358_v46 = vpop.xlane.xlu2 %918  ;;  %v972_v50 = vmul.f32 %v1616_v42, %v2341_v28  ;;  %1617 = vrcp.f32 %v2356_v45  ;;  %v969_v52 = vsel %vm966_vm13, %v968_v49, %v964_v48  ;;  %vm977_vm0 = vweird.f32 %v1616_v42  ;;  %vm993_vm3 = vmor %vm991_vm15, %vm992_vm14 }
 0x3c1   : > { %v988_v51 = vsub.f32 1.0, %v987_v44  ;;  %1619 = vrcp.f32 %v2358_v46  ;;  %v970_v57 = vmul.f32 %v2314_v47, %v969_v52  ;;  %vm978_vm6 = vmor %vm976_vm2, %vm977_vm0  ;;  %v1025_v17 = vand.u32 2147483647, %v2356_v45  ;;  %v694_v52 = vld [vmem:[#allocation10 + $0x70] sm:$0xff] }
 0x3c2   : > { %v973_v55 = vsub.f32 1.0, %v972_v50  ;;  %v1027_v20 = vand.u32 2147483648, %v2356_v45  ;;  %v1012_v21 = vand.u32 2147483648, %v2358_v46  ;;  %vm1021_vm9 = vweird.f32 %v2356_v45 }
 0x3c3   : > { %v989_v59 = vmul.f32 %v1614_v41, %v988_v51  ;;  %1048 = vst.msk [vmem:[%s2347_s19 + $0x10] sm:$0xff] %vm853_vm1, %v970_v57  ;;  %v1060_v1 = vsel %vm853_vm1, %v970_v57, 0.0  ;;  %vm1006_vm10 = vweird.f32 %v2358_v46  ;;  %vm1026_vm12 = vcmp.eq.f32.partialorder %v1025_v17, 8.507059e+37  ;;  %v695_v51 = vld [vmem:[#allocation10 + $0x78] sm:$0xff] }
 0x3c4   : > { %v974_v0 = vmul.f32 %v1616_v42, %v973_v55  ;;  %1061 = vadd.xlane.f32.xlu2 %v1060_v1  ;;  %v1028_v29 = vor.u32 1.1754944e-38, %v1027_v20  ;;  %v1013_v32 = vor.u32 1.1754944e-38, %v1012_v21  ;;  %696 = vmatpush.msra.mxu2 %v695_v51  ;;  %v693_v55 = vld [vmem:[#allocation10 + $0x68] sm:$0xff]  ;;  %v682_v20 = vld [vmem:[#allocation10 + $0x10] sm:$0xff] }
 0x3c5   : > { %v990_v4 = vadd.f32 %v1614_v41, %v989_v59  ;;  %v692_v59 = vld [vmem:[#allocation10 + $0x60] sm:$0xff] }
 0x3c6   : > { %v1618_v47 = vpop.eup %1617  ;;  %v975_v6 = vadd.f32 %v1616_v42, %v974_v0  ;;  %697 = vmatpush.msra.mxu2 %v694_v52  ;;  %v689_v0 = vld [vmem:[#allocation10 + $0x48] sm:$0xff]  ;;  %v1924_v52 = vmov 128.0  }
 0x3c7   : > { %v1620_v7 = vpop.eup %1619  ;;  %v1017_v8 = vmul.f32 %v1618_v47, %v2356_v45  ;;  %v2374_v9 = vpop.xlane.xlu0 %924  ;;  %v994_v10 = vsel %vm993_vm3, %v1614_v41, %v990_v4  ;;  %vm1022_vm7 = vweird.f32 %v1618_v47  ;;  %v1087_v4 = vand.u32 127, %v787_v54 }
 0x3c8   : > { %v1002_v11 = vmul.f32 %v1620_v7, %v2358_v46  ;;  %1621 = vrcp.f32 %v2374_v9  ;;  %v999_v12 = vsel %vm996_vm4, %v998_v5, %v994_v10  ;;  %v979_v16 = vsel %vm978_vm6, %v1616_v42, %v975_v6  ;;  %vm1023_vm11 = vmor %vm1021_vm9, %vm1022_vm7  ;;  %698 = vmatpush.msra.mxu2 %v693_v55  ;;  %v687_v5 = vld [vmem:[#allocation10 + $0x38] sm:$0xff]  ;;  %v686_v6 = vld [vmem:[#allocation10 + $0x30] sm:$0xff] }
 0x3c9   : > { %v1018_v14 = vsub.f32 1.0, %v1017_v8  ;;  %v1000_v15 = vmul.f32 %v2318_v53, %v999_v12  ;;  %v984_v19 = vsel %vm981_vm5, %v983_v13, %v979_v16  ;;  %vm1007_vm8 = vweird.f32 %v1620_v7  ;;  %v685_v10 = vld [vmem:[#allocation10 + $0x28] sm:$0xff]  ;;  %v684_v13 = vld [vmem:[#allocation10 + $0x20] sm:$0xff]  ;;  %v683_v16 = vld [vmem:[#allocation10 + $0x18] sm:$0xff] }
 0x3ca   : > { %v1003_v18 = vsub.f32 1.0, %v1002_v11  ;;  %v985_v24 = vmul.f32 %v2320_v56, %v984_v19  ;;  %v1010_v53 = vand.u32 2147483647, %v2358_v46  ;;  %vm1008_vm13 = vmor %vm1006_vm10, %vm1007_vm8  ;;  %v1042_v37 = vand.u32 2147483648, %v2374_v9  ;;  %699 = vmatpush.msra.mxu2 %v692_v59 }
 0x3cb   : > { %v1019_v22 = vmul.f32 %v1618_v47, %v1018_v14  ;;  %1050 = vst.msk [vmem:[%s2347_s19 + $0x20] sm:$0xff] %vm853_vm1, %v1000_v15  ;;  %v1066_v23 = vsel %vm853_vm1, %v1000_v15, 0.0  ;;  %v1040_v42 = vand.u32 2147483647, %v2374_v9  ;;  %vm1036_vm0 = vweird.f32 %v2374_v9 }
 0x3cc   : > { %v1004_v25 = vmul.f32 %v1620_v7, %v1003_v18  ;;  %1067 = vadd.xlane.f32.xlu2 %v1066_v23  ;;  %v1063_v26 = vsel %vm853_vm1, %v985_v24, 0.0  ;;  %1049 = vst.msk [vmem:[%s2347_s19 + $0x18] sm:$0xff] %vm853_vm1, %v985_v24  ;;  %vm1011_vm14 = vcmp.eq.f32.partialorder %v1010_v53, 8.507059e+37  ;;  %vm1096_vm4 = vcmask 1041409   ;;  %v681_v23 = vld [vmem:[#allocation10 + $0x8] sm:$0xff]  ;;  %v680_v53 = vld [vmem:[#allocation10] sm:$0xff] }
 0x3cd   : > { %v1020_v27 = vadd.f32 %v1618_v47, %v1019_v22  ;;  %1064 = vadd.xlane.f32.xlu1 %v1063_v26  ;;  %vm1041_vm3 = vcmp.eq.f32.partialorder %v1040_v42, 8.507059e+37  ;;  %vm1098_vm5 = vcmask 1042434   ;;  %vm1100_vm6 = vcmask 1043459   ;;  %v1171_v42 = vld [vmem:[#allocation11 + $0x10] sm:$0xff] }
 0x3ce   : > { %v1622_v28 = vpop.eup %1621  ;;  %v1005_v56 = vadd.f32 %v1620_v7, %v1004_v25  ;;  %vm1102_vm7 = vcmask 1044484   ;;  %vm1104_vm8 = vcmask 1045509   ;;  %vm1106_vm9 = vcmask 1046534  }
 0x3cf   : > { %v1032_v30 = vmul.f32 %v1622_v28, %v2374_v9  ;;  %v1024_v31 = vsel %vm1023_vm11, %v1618_v47, %v1020_v27  ;;  %vm1037_vm15 = vweird.f32 %v1622_v28  ;;  %vm1108_vm10 = vcmask 1047559   ;;  %v606_v27 = vld [vmem:[%s515_s20] sm:$0x1] }
 0x3d0   : > { %v1029_v33 = vsel %vm1026_vm12, %v1028_v29, %v1024_v31  ;;  %v1009_v34 = vsel %vm1008_vm13, %v1620_v7, %v1005_v56  ;;  %vm1038_vm2 = vmor %vm1036_vm0, %vm1037_vm15  ;;  %v1184_v56 = vld [vmem:[#allocation11 + $0x78] sm:$0xff]  ;;  %v1182_v31 = vld [vmem:[#allocation11 + $0x68] sm:$0xff]  ;;  %1623 = vrcp.f32 %v1924_v52 }
 0x3d1   : > { %v1033_v35 = vsub.f32 1.0, %v1032_v30  ;;  %v1030_v38 = vmul.f32 %v2326_v61, %v1029_v33  ;;  %v1014_v39 = vsel %vm1011_vm14, %v1013_v32, %v1009_v34  ;;  %v1183_v30 = vld [vmem:[#allocation11 + $0x70] sm:$0xff]  ;;  %1185 = vmatpush.msrb.mxu1 %v1184_v56  ;;  %v1181_v32 = vld [vmem:[#allocation11 + $0x60] sm:$0xff]  ;;  %v1180_v33 = vld [vmem:[#allocation11 + $0x58] sm:$0xff] }
 0x3d2   : > { %v1015_v40 = vmul.f32 %v2328_v63, %v1014_v39  ;;  %v1043_v63 = vor.u32 1.1754944e-38, %v1042_v37  ;;  %v1179_v34 = vld [vmem:[#allocation11 + $0x50] sm:$0xff]  ;;  %v1176_v39 = vld [vmem:[#allocation11 + $0x38] sm:$0xff]  ;;  %v1174_v37 = vld [vmem:[#allocation11 + $0x28] sm:$0xff] }
 0x3d3   : > { %v1034_v36 = vmul.f32 %v1622_v28, %v1033_v35  ;;  %1052 = vst.msk [vmem:[%s2347_s19 + $0x30] sm:$0xff] %vm853_vm1, %v1030_v38  ;;  %v1072_v41 = vsel %vm853_vm1, %v1030_v38, 0.0  ;;  %1186 = vmatpush.msrb.mxu1 %v1183_v30  ;;  %v1178_v35 = vld [vmem:[#allocation11 + $0x48] sm:$0xff]  ;;  %v1177_v38 = vld [vmem:[#allocation11 + $0x40] sm:$0xff] }
 0x3d4   : > { %v1069_v44 = vsel %vm853_vm1, %v1015_v40, 0.0  ;;  %1051 = vst.msk [vmem:[%s2347_s19 + $0x28] sm:$0xff] %vm853_vm1, %v1015_v40  ;;  %1073 = vadd.xlane.f32.xlu2 %v1072_v41  ;;  %v1175_v40 = vld [vmem:[#allocation11 + $0x30] sm:$0xff]  ;;  %v1172_v41 = vld [vmem:[#allocation11 + $0x18] sm:$0xff] }
 0x3d5   : > { %v1035_v61 = vadd.f32 %v1622_v28, %v1034_v36  ;;  %1070 = vadd.xlane.f32.xlu1 %v1069_v44  ;;  %1187 = vmatpush.msrb.mxu1 %v1182_v31  ;;  %v1173_v36 = vld [vmem:[#allocation11 + $0x20] sm:$0xff] }
 0x3d6   : > { %v1624_v55 = vpop.eup %1623 }
 0x3d7   : > { %v1039_v45 = vsel %vm1038_vm2, %v1622_v28, %v1035_v61  ;;  %1188 = vmatpush.msrb.mxu1 %v1181_v32  ;;  %v1170_v61 = vld [vmem:[#allocation11 + $0x8] sm:$0xff] }
 0x3d8   : > { %v1044_v46 = vsel %vm1041_vm3, %v1043_v63, %v1039_v45  ;;  %v1169_v63 = vld [vmem:[#allocation11] sm:$0xff] }
 0x3d9   : > { %v1045_v48 = vmul.f32 %v2334_v3, %v1044_v46  ;;  %v691_v3 = vld [vmem:[#allocation10 + $0x58] sm:$0xff]  ;;  %1189 = vmatpush.msrb.mxu1 %v1180_v33 }
 0x3da   : > { %700 = vmatpush.msra.mxu2 %v691_v3 }
 0x3db   : > { %1053 = vst.msk [vmem:[%s2347_s19 + $0x38] sm:$0xff] %vm853_vm1, %v1045_v48  ;;  %v1075_v49 = vsel %vm853_vm1, %v1045_v48, 0.0  ;;  %1190 = vmatpush.msrb.mxu1 %v1179_v34 }
 0x3dc   : > { %701 = vmatpush.msra.mxu2 %v690_v62 }
 0x3dd   : > { %1076 = vadd.xlane.f32.xlu1 %v1075_v49  ;;  %1191 = vmatpush.msrb.mxu1 %v1178_v35 }
 0x3de   : > { %702 = vmatpush.msra.mxu2 %v689_v0 }
 0x3df   : > { %1192 = vmatpush.msrb.mxu1 %v1177_v38 }
 0x3e0   : > { %703 = vmatpush.msra.mxu2 %v688_v2 }
 0x3e1   : > { %1193 = vmatpush.msrb.mxu1 %v1176_v39 }
 0x3e2   : > { %704 = vmatpush.msra.mxu2 %v687_v5 }
 0x3e3   : > { %1194 = vmatpush.msrb.mxu1 %v1175_v40 }
 0x3e4   : > { %705 = vmatpush.msra.mxu2 %v686_v6 }
 0x3e5   : > { %1195 = vmatpush.msrb.mxu1 %v1174_v37 }
 0x3e6   : > { %706 = vmatpush.msra.mxu2 %v685_v10 }
 0x3e7   : > { %1196 = vmatpush.msrb.mxu1 %v1173_v36 }
 0x3e8   : > { %707 = vmatpush.msra.mxu2 %v684_v13 }
 0x3e9   : > { %1197 = vmatpush.msrb.mxu1 %v1172_v41 }
 0x3ea   : > { %708 = vmatpush.msra.mxu2 %v683_v16 }
 0x3eb   : > { %1198 = vmatpush.msrb.mxu1 %v1171_v42 }
 0x3ec   : > { %709 = vmatpush.msra.mxu2 %v682_v20 }
 0x3ed   : > { %1199 = vmatpush.msrb.mxu1 %v1170_v61 }
 0x3ee   : > { %710 = vmatpush.msra.mxu2 %v681_v23 }
 0x3ef   : > { %1200 = vmatpush.msrb.mxu1 %v1169_v63 }
 0x3f0   : > { %711 = vmatpush.msra.mxu2 %v680_v53 }
 0x3f1   : > { %712 = vmatmul.f32.vlgmr.msra.gmra.mxu2 %v606_v27 }
 0x42e   : > { %v1059_v58 = vpop.xlane.xlu1 %1058 }
 0x42f   : > { %v1056_v50 = vpop.xlane.xlu2 %1055  ;;  %v1089_v7 = vperm.slane %v1059_v58, %v1087_v4 }
 0x430   : > { %v1088_v8 = vperm.slane %v1056_v50, %v1087_v4 }
 0x432   : > { %v1097_v14 = vsel %vm1096_vm4, %v1089_v7, %v1088_v8 }
 0x437   : > { %v1062_v57 = vpop.xlane.xlu2 %1061 }
 0x438   : > { %v1090_v9 = vperm.slane %v1062_v57, %v1087_v4  ;;  %v1208_v57 = vmul.f32 128.0, %v1624_v55 }
 0x43a   : > { %v1099_v54 = vsel %vm1098_vm5, %v1090_v9, %v1097_v14  ;;  %v1209_v58 = vsub.f32 1.0, %v1208_v57 }
 0x43c   : > { %v1210_v59 = vmul.f32 %v1624_v55, %v1209_v58 }
 0x43e   : > { %v1211_v60 = vadd.f32 %v1624_v55, %v1210_v59 }
 0x43f   : > { %v1068_v47 = vpop.xlane.xlu2 %1067 }
 0x440   : > { %v1065_v1 = vpop.xlane.xlu1 %1064  ;;  %v1092_v15 = vperm.slane %v1068_v47, %v1087_v4 }
 0x441   : > { %v1091_v11 = vperm.slane %v1065_v1, %v1087_v4 }
 0x443   : > { %v1101_v17 = vsel %vm1100_vm6, %v1091_v11, %v1099_v54 }
 0x444   : > { %v1103_v21 = vsel %vm1102_vm7, %v1092_v15, %v1101_v17 }
 0x447   : > { %v1074_v19 = vpop.xlane.xlu2 %1073 }
 0x448   : > { %v1071_v12 = vpop.xlane.xlu1 %1070  ;;  %v1094_v22 = vperm.slane %v1074_v19, %v1087_v4 }
 0x449   : > { %v1093_v18 = vperm.slane %v1071_v12, %v1087_v4 }
 0x44b   : > { %v1105_v24 = vsel %vm1104_vm8, %v1093_v18, %v1103_v21 }
 0x44c   : > { %v1107_v28 = vsel %vm1106_vm9, %v1094_v22, %v1105_v24 }
 0x450   : > { %v1077_v25 = vpop.xlane.xlu1 %1076 }
 0x451   : > { %v1095_v26 = vperm.slane %v1077_v25, %v1087_v4 }
 0x453   : > { %v1109_v29 = vsel %vm1108_vm10, %v1095_v26, %v1107_v28 }
 0x454   : > { %1111 = vxpose.xlu2.b32.start.end [1/1] (short) (narrow) %v1109_v29, 8 }
 0x474   : > { %v713_v45 = vpop.f32.mrf.mxu2 }
 0x475   : > { %v1167_v46 = vperm.slane %v713_v45, 0 }
 0x4ed   : > { %v1127_v44 = vpop.trf.xlu2 }
 0x4ee   : > { %1479 = vmatmul.msk.f32.vlgmr.msrb.gmra.mxu0 %vm853_vm1, %v1127_v44  ;;  %vm1212_vm1 = vweird.f32 %v1624_v55 }
 0x4ef   : > { %v1213_v3 = vsel %vm1212_vm1, %v1624_v55, %v1211_v60 }
 0x56b   : > { %v1164_v48 = vpop.f32.mrf.mxu0 }
 0x56c   : > { %v1168_v49 = vmul.f32 %v1167_v46, %v1164_v48 }
 0x56e   : > { %1201 = vmatmul.f32.vlgmr.msrb.gmra.mxu1 %v1168_v49 }
 0x5eb   : > { %v1202_v50 = vpop.f32.mrf.mxu1 }
 0x5ec   : > { %v1203_v51 = vadd.f32 %v1202_v50, %v2266_v43 }
 0x5ee   : > { %1205 = vadd.xlane.f32.xlu1 %v1203_v51 }
 0x661   : > { %v1206_v62 = vpop.xlane.xlu1 %1205 }
 0x662   : > { %v1214_v0 = vmul.f32 %v1213_v3, %v1206_v62 }
 0x664   : > { %v1215_v1 = vsub.f32 %v1203_v51, %v1214_v0 }
 0x666   : > { %v1216_v2 = vmul.f32 %v1215_v1, %v1215_v1 }
 0x668   : > { %1217 = vadd.xlane.f32.xlu0 %v1216_v2 }
 0x669   : > { %1834 = shalt.err (!%p1831_p12)
}
 0x66a   : > { %s1925_s21 = smov 128   ;;  %s1926_s19 = smov 8  }
 0x66b   : > { %1507 = dma.vmem_to_hbm [thread:$0]  (%p2066_p0), %s1276_s2, 1024, %s1278_s18, %s1249_s23, %s1925_s21, %s1925_s21, %s1926_s19  }
 0x66c   : > { %s1482_s17 = sshll.u32 %s2021_s15, 3  ;;  %s2536_s16 = sld [smem:[#allocation33_spill]] }
 0x66d   : > { %s2537_s27 = sld [smem:[#allocation35_spill]]  ;;  %s593_s15 = scalar_lea.vmem [#allocation13], %s2158_s7 }
 0x66e   : > { %s2539_s11 = sld [smem:[#allocation34_spill]]  ;;  %s1261_s24 = sshll.u32 %s593_s15, 4  ;;  %s1262_s24 = int_to_ptr.vmem [resolvable:$true] %s1261_s24 }
 0x66f   : > { %s1244_s9 = scalar_lea.sflag [#allocation4], %s2155_s6 }
 0x672   : > { %v1589_v11 = vld [vmem:[%s2536_s16] ss:$0 sm:$0xff] }
 0x673   : > { %s2538_s2 = smov %s2537_s27  ;;  %s1259_s18 = scalar_lea.hbm %s2537_s27, %s1482_s17 }
 0x674   : > { %v1590_v14 = vld [vmem:[%s2539_s11] ss:$0 sm:$0xff]  ;;  %s1263_s5 = sshll.u32 %s1259_s18, 4  ;;  %s1855_s17 = scalar_lea.hbm %s2538_s2, 16  ;;  %s1264_s5 = int_to_ptr.hbm [resolvable:$true] %s1263_s5 }
 0x675   : > { %s1849_s29 = sshra.s32 %s1264_s5, 4  ;;  %s1850_s29 = int_to_ptr.hbm [resolvable:$true] %s1849_s29 }
 0x676   : > { %s1851_s25 = scalar_lea.hbm %s1850_s29, 8  ;;  %p1856_p2 = scmp.lt.s32.totalorder %s1850_s29, %s2538_s2 }
 0x677   : > { %p1852_p3 = scmp.ne.s32.totalorder %s1850_s29, %s1851_s25  ;;  %p1857_p13 = scmp.lt.s32.totalorder %s1855_s17, %s1851_s25 }
 0x679   : > { %p1853_p8 = pnand %p1852_p3, %p2066_p0  ;;  %p1858_p4 = por %p1857_p13, %p1856_p2 }
 0x67b   : > { %p1854_p9 = pneg %p1853_p8 }
 0x67d   : > { %p1859_p1 = pnand %p1858_p4, %p1854_p9 }
 0x6db   : > { %v1218_v43 = vpop.xlane.xlu0 %1217 }
 0x6dc   : > { %v1219_v4 = vmul.f32 %v1218_v43, %v1213_v3 }
 0x6de   : > { %v1220_v47 = vadd.f32 1e-05, %v1219_v4 }
 0x6e0   : > { %1625 = vrsqrt.f32 %v1220_v47  ;;  %vm1227_vm12 = vweird.f32 %v1220_v47 }
 0x6e6   : > { %v1626_v5 = vpop.eup %1625 }
 0x6e7   : > { %v1222_v6 = vmul.f32 %v1626_v5, %v1220_v47  ;;  %vm1228_vm11 = vweird.f32 %v1626_v5 }
 0x6e8   : > { %vm1229_vm13 = vmor %vm1227_vm12, %vm1228_vm11 }
 0x6e9   : > { %v1223_v7 = vmul.f32 %v1626_v5, %v1222_v6 }
 0x6eb   : > { %v1224_v8 = vmul.f32 0.5, %v1223_v7 }
 0x6ed   : > { %v1225_v9 = vsub.f32 1.5, %v1224_v8 }
 0x6ef   : > { %v1226_v10 = vmul.f32 %v1626_v5, %v1225_v9 }
 0x6f1   : > { %v1230_v12 = vsel %vm1229_vm13, %v1626_v5, %v1226_v10 }
 0x6f2   : > { %v1231_v13 = vmul.f32 %v1230_v12, %v1215_v1 }
 0x6f4   : > { %v1236_v54 = vmul.f32 %v1589_v11, %v1231_v13 }
 0x6f6   : > { %v1241_v15 = vadd.f32 %v1590_v14, %v1236_v54 }
 0x6f8   : > { %1242 = vst [vmem:[%s593_s15] sm:$0xff] %v1241_v15 }
 0x6f9   : > { %1862 = shalt.err (!%p1859_p1)
}
 0x6fa   : > { %1506 = dma.vmem_to_hbm [thread:$0]  (%p2066_p0), %s1262_s24, 128, %s1264_s5, %s1244_s9  }
 0x6fb PF: > { %s2540_s6 = sld [smem:[#allocation22_spill]]  ;;  %p2542_p6 = scmp.ge.s32.totalorder %s1917_s28, 2 }
 0x6fd   : > { %p1531_p7 = pnand %p2542_p6, %p2074_p5 }
 0x6ff   : > { %p1532_p10 = pneg %p1531_p7 }
 0x701   : > { %s1292_s16 = sand.u32 1, %s2540_s6  }
 0x702   : > { %s1293_s10 = scalar_lea.sflag [#allocation4], %s1292_s16 }
 0x703   : > { %1896 = dma.done.wait (%p1532_p10), %s1293_s10, 128  }
 0x704   : > { %1898 = vsyncadd (%p1532_p10), %s1293_s10, 4294967168  ;;  %s1303_s13 = scalar_lea.sflag [#allocation15], %s1292_s16 }
 0x705   : > { %1900 = dma.done.wait (%p1532_p10), %s1303_s13, 1024  }
 0x706   : > { %1902 = vsyncadd (%p1532_p10), %s1303_s13, 4294966272  ;;  %s2543_s28 = sld [smem:[#allocation24_spill]]  ;;  %s2546_s25 = smov %s1909_s26 }
 0x707   : > { %s2544_s27 = sld [smem:[#allocation23_spill]] }
 0x708   : > { %s2545_s20 = sld [smem:[#allocation25_spill]] }
 0x70c   : > { %p35_p0 = scmp.ge.s32.totalorder %s2543_s28, 4  }
 0x70d   : > { %s2547_s26 = smov %s2544_s27 }
 0x70e   : > { %s2548_s27 = smov %s2545_s20  ;;  %37 = sbr.rel (!%p35_p0) target bundleno = 21 (0x15), region = 169 }
 0x713   :  { %1309 = vsyncpa [#allocation3], 1 }
 0x714   :  { %1311 = vsyncpa [#allocation3 + $0x1], 1 }
 0x715   :  { %1312 = vsyncpa [#allocation6], 1 }
 0x716   :  { %1314 = vsyncpa [#allocation6 + $0x1], 1 }
 0x717   :  { %1315 = vsyncpa [#allocation9], 1 }
 0x718   :  { %1316 = vsyncpa [#allocation12], 1 }
 0x719   :  { %1317 = vsyncpa [#allocation4], 1 }
 0x71a   :  { %1319 = vsyncpa [#allocation4 + $0x1], 1 }
 0x71b   :  { %1320 = vsyncpa [#allocation15], 1 }
 0x71c   :  { %1322 = vsyncpa [#allocation15 + $0x1], 1 }

</bundles_post_ra>
